<compile_context>
chip_gen: v7x
topology: tpu7x:2x2x1
jax: 0.10.0
libtpu: 0.0.40
codegen_flags: <defaults>
</compile_context>

<pallas_src>
import math

import jax
import jax.numpy as jnp
from jax.experimental import pallas as pl
from jax.experimental.pallas import tpu as pltpu

# ---- hyper-parameters from the PyTorch module -------------------------------
ALPHA = 0.5
DROPOUT = 0.1          # identity at inference
HIDDEN_DIM = 256
INPUT_DIM = 54
LAMBDA = 1.5
LAYER = 8
NUM_CLASSES = 2
VARIANT = True

N_NODES = 128          # small synthetic graph size
PAD_IN = 128           # lane-dense padding of the 54-wide input features
PAD_OUT = 128          # lane-dense padding of the 2-wide class output


# ---------------------------- fused Pallas kernel ----------------------------
def _gcnii_fused_kernel(x_ref, adj_ref, wfc0_ref, bfc0_ref, weff_ref,
                        wfc1_ref, bfc1_ref, out_ref, h_ref, cat_ref):
    """One grid step == one GCNII layer; fc0 at step 0, fc1 at the last step.

    Resident state (VMEM scratch, persists across grid steps):
      h_ref   : (N, H)   current activation h_l
      cat_ref : (N, 2H)  [hi, h0]; the h0 half is written once at step 0
    Per-layer math (variant=True, residual=True), with theta folded into
    weff_ref host-side:
      hi      = adj @ h
      h_next  = relu([hi, h0] @ W_eff_l + h)
    """
    l = pl.program_id(0)
    H = HIDDEN_DIM

    # --- first grid step: fc0 + ReLU, initialize resident state --------------
    @pl.when(l == 0)
    def _():
        h0 = jnp.maximum(
            jnp.dot(x_ref[...], wfc0_ref[...],
                    preferred_element_type=jnp.float32) + bfc0_ref[...],
            0.0)
        h_ref[...] = h0
        cat_ref[:, H:] = h0          # h0 half of [hi, h0]; constant across layers

    # --- GCNII layer l --------------------------------------------------------
    h = h_ref[...]
    hi = jnp.dot(adj_ref[...], h, preferred_element_type=jnp.float32)
    cat_ref[:, :H] = hi
    h_new = jnp.maximum(
        jnp.dot(cat_ref[...], weff_ref[...],
                preferred_element_type=jnp.float32) + h,
        0.0)
    h_ref[...] = h_new

    # --- last grid step: fc1 into a lane-dense (N, PAD_OUT) output slab ------
    @pl.when(l == pl.num_programs(0) - 1)
    def _():
        out_ref[...] = (jnp.dot(h_new, wfc1_ref[...],
                                preferred_element_type=jnp.float32)
                        + bfc1_ref[...])


def _resident_spec(shape):
    """Full-array VMEM block whose index never changes -> DMA'd once."""
    zeros = (0,) * len(shape)
    return pl.BlockSpec(shape, lambda l: zeros)


# ---------------------------- wrapper -----------------------------------------
def prepare_kernel_params(params):
    """Pad fc weights lane-dense and fold theta into the conv weights."""
    H = HIDDEN_DIM
    thetas = jnp.asarray(
        [math.log(LAMBDA / l + 1.0) for l in range(1, LAYER + 1)], jnp.float32)
    eye = jnp.eye(H, dtype=jnp.float32)
    # A such that [hi, h0] @ A == (1-alpha)*hi + alpha*h0  (== r)
    a = jnp.concatenate([(1.0 - ALPHA) * eye, ALPHA * eye], axis=0)   # (2H, H)
    # W_eff_l = theta_l * W_l + (1 - theta_l) * A   -> single K=512 matmul
    weff = (thetas[:, None, None] * params["w_conv"]
            + (1.0 - thetas)[:, None, None] * a[None])                # (LAYER,2H,H)

    wfc0 = jnp.zeros((PAD_IN, H), jnp.float32).at[:INPUT_DIM, :].set(
        params["w_fc0"])
    wfc1 = jnp.zeros((H, PAD_OUT), jnp.float32).at[:, :NUM_CLASSES].set(
        params["w_fc1"])
    bfc1 = jnp.zeros((1, PAD_OUT), jnp.float32).at[:, :NUM_CLASSES].set(
        params["b_fc1"])
    return {"wfc0": wfc0, "bfc0": params["b_fc0"], "weff": weff,
            "wfc1": wfc1, "bfc1": bfc1}


@jax.jit
def gcnii_forward(x, adj, kp):
    """Full Model.forward (inference): fc0+ReLU -> 8 GCNII layers -> fc1."""
    # TODO(synk): F.dropout is stochastic; implemented as identity (eval mode).
    n = x.shape[0]
    H = HIDDEN_DIM
    x_pad = jnp.zeros((n, PAD_IN), jnp.float32).at[:, :x.shape[1]].set(x)

    out_slab = pl.pallas_call(
        _gcnii_fused_kernel,
        out_shape=jax.ShapeDtypeStruct((n, PAD_OUT), jnp.float32),
        grid=(LAYER,),
        in_specs=[
            _resident_spec((n, PAD_IN)),                         # x (padded)
            _resident_spec((n, n)),                              # adj
            _resident_spec((PAD_IN, H)),                         # w_fc0 (padded)
            _resident_spec((1, H)),                              # b_fc0
            pl.BlockSpec((None, 2 * H, H), lambda l: (l, 0, 0)),  # W_eff[l]
            _resident_spec((H, PAD_OUT)),                        # w_fc1 (padded)
            _resident_spec((1, PAD_OUT)),                        # b_fc1 (padded)
        ],
        out_specs=pl.BlockSpec((n, PAD_OUT), lambda l: (0, 0)),
        scratch_shapes=[
            pltpu.VMEM((n, H), jnp.float32),       # resident h
            pltpu.VMEM((n, 2 * H), jnp.float32),   # resident [hi, h0]
        ],
        compiler_params=pltpu.CompilerParams(
            dimension_semantics=("arbitrary",)),   # sequential layer recurrence
    )(x_pad, adj, kp["wfc0"], kp["bfc0"], kp["weff"], kp["wfc1"], kp["bfc1"])

    return out_slab[:, :NUM_CLASSES]


# ---------------------------- reference (pure JAX) ----------------------------
def gcnii_reference(x, adj, params):
    h = jnp.maximum(x @ params["w_fc0"] + params["b_fc0"], 0.0)
    h0 = h
    for l in range(1, LAYER + 1):
        theta = math.log(LAMBDA / l + 1.0)
        w = params["w_conv"][l - 1]                               # (2H, H)
        hi = adj @ h
        support = jnp.concatenate([hi, h0], axis=1)
        r = (1.0 - ALPHA) * hi + ALPHA * h0
        out = theta * (support @ w) + (1.0 - theta) * r + h
        h = jnp.maximum(out, 0.0)
    return h @ params["w_fc1"] + params["b_fc1"]


# ---------------------------- parameter init ----------------------------------
def init_params(key):
    keys = jax.random.split(key, 4 + LAYER)
    params = {}
    # nn.Linear(INPUT_DIM, HIDDEN_DIM): uniform(-1/sqrt(fan_in), 1/sqrt(fan_in))
    bnd0 = 1.0 / math.sqrt(INPUT_DIM)
    params["w_fc0"] = jax.random.uniform(keys[0], (INPUT_DIM, HIDDEN_DIM),
                                         jnp.float32, -bnd0, bnd0)
    params["b_fc0"] = jax.random.uniform(keys[1], (1, HIDDEN_DIM),
                                         jnp.float32, -bnd0, bnd0)
    # nn.Linear(HIDDEN_DIM, NUM_CLASSES)
    bnd1 = 1.0 / math.sqrt(HIDDEN_DIM)
    params["w_fc1"] = jax.random.uniform(keys[2], (HIDDEN_DIM, NUM_CLASSES),
                                         jnp.float32, -bnd1, bnd1)
    params["b_fc1"] = jax.random.uniform(keys[3], (1, NUM_CLASSES),
                                         jnp.float32, -bnd1, bnd1)
    # GraphConvolution weights: (2*H, H), uniform(-1/sqrt(H), 1/sqrt(H)), stacked.
    stdv = 1.0 / math.sqrt(HIDDEN_DIM)
    params["w_conv"] = jnp.stack([
        jax.random.uniform(keys[4 + i], (2 * HIDDEN_DIM, HIDDEN_DIM),
                           jnp.float32, -stdv, stdv)
        for i in range(LAYER)
    ])                                                            # (LAYER, 2H, H)
    return params


# ---------------------------- main ---------------------------------------------
if __name__ == "__main__":
    key = jax.random.PRNGKey(0)
    k_x, k_adj, k_p = jax.random.split(key, 3)

    # node features (N, 54) and a dense row-normalized adjacency (N, N)
    x = jax.random.normal(k_x, (N_NODES, INPUT_DIM), jnp.float32)
    a = jax.random.uniform(k_adj, (N_NODES, N_NODES), jnp.float32)
    adj = a / jnp.sum(a, axis=1, keepdims=True)

    params = init_params(k_p)
    kp = prepare_kernel_params(params)

    out = jax.block_until_ready(gcnii_forward(x, adj, kp))
    assert out.shape == (N_NODES, NUM_CLASSES) and out.dtype == jnp.float32

    ref = jax.block_until_ready(gcnii_reference(x, adj, params))
    max_err = float(jnp.max(jnp.abs(out - ref)))
    if max_err > 1e-2:
        raise AssertionError(f"Pallas output mismatch, max abs err = {max_err}")

    print("KERNEL_OK")
</pallas_src>

<mosaic_0001>
module attributes {stable_mosaic.version = 11 : i64} {
  func.func @_gcnii_fused_kernel(%arg0: i32, %arg1: memref<128x128xf32, #tpu.memory_space<vmem>>, %arg2: memref<128x128xf32, #tpu.memory_space<vmem>>, %arg3: memref<128x256xf32, #tpu.memory_space<vmem>>, %arg4: memref<1x256xf32, #tpu.memory_space<vmem>>, %arg5: memref<1x512x256xf32, #tpu.memory_space<vmem>>, %arg6: memref<256x128xf32, #tpu.memory_space<vmem>>, %arg7: memref<1x128xf32, #tpu.memory_space<vmem>>, %arg8: memref<128x128xf32, #tpu.memory_space<vmem>>, %arg9: memref<128x256xf32, #tpu.memory_space<vmem>>, %arg10: memref<128x512xf32, #tpu.memory_space<vmem>>) attributes {dimension_semantics = [#tpu.dimension_semantics<arbitrary>], iteration_bounds = array<i64: 8>, scalar_prefetch = 0 : i64, scratch_operands = 2 : i64, tpu.core_type = #tpu.core_type<tc>, window_params = [{pipeline_mode = #tpu.pipeline_mode<synchronous>, transform_indices = @transform_0, window_bounds = array<i64: 128, 128>}, {pipeline_mode = #tpu.pipeline_mode<synchronous>, transform_indices = @transform_1, window_bounds = array<i64: 128, 128>}, {pipeline_mode = #tpu.pipeline_mode<synchronous>, transform_indices = @transform_2, window_bounds = array<i64: 128, 256>}, {pipeline_mode = #tpu.pipeline_mode<synchronous>, transform_indices = @transform_3, window_bounds = array<i64: 1, 256>}, {transform_indices = @transform_4, window_bounds = array<i64: 1, 512, 256>}, {pipeline_mode = #tpu.pipeline_mode<synchronous>, transform_indices = @transform_5, window_bounds = array<i64: 256, 128>}, {pipeline_mode = #tpu.pipeline_mode<synchronous>, transform_indices = @transform_6, window_bounds = array<i64: 1, 128>}, {pipeline_mode = #tpu.pipeline_mode<synchronous>, transform_indices = @transform_7, window_bounds = array<i64: 128, 128>}]} {
    %c0_i32 = arith.constant 0 : i32
    %0 = arith.cmpi eq, %arg0, %c0_i32 : i32
    %1 = arith.extui %0 : i1 to i32
    %c0_i32_0 = arith.constant 0 : i32
    %2 = arith.cmpi ne, %1, %c0_i32_0 : i32
    scf.if %2 {
      %c0_16 = arith.constant 0 : index
      %c0_17 = arith.constant 0 : index
      %18 = vector.load %arg1[%c0_16, %c0_17] : memref<128x128xf32, #tpu.memory_space<vmem>>, vector<128x128xf32>
      %c0_18 = arith.constant 0 : index
      %c0_19 = arith.constant 0 : index
      %19 = vector.load %arg3[%c0_18, %c0_19] : memref<128x256xf32, #tpu.memory_space<vmem>>, vector<128x256xf32>
      %cst_20 = arith.constant dense<0.000000e+00> : vector<128x256xf32>
      %20 = tpu.matmul %18, %19, %cst_20 {dimension_numbers = #tpu.dot_dimension_numbers<[1], [0], [0], [1], [0, 0, 1, 1], [], []>} : vector<128x128xf32>, vector<128x256xf32>, vector<128x256xf32> -> vector<128x256xf32>
      %c0_21 = arith.constant 0 : index
      %c0_22 = arith.constant 0 : index
      %21 = vector.load %arg4[%c0_21, %c0_22] : memref<1x256xf32, #tpu.memory_space<vmem>>, vector<1x256xf32>
      %22 = vector.broadcast %21 : vector<1x256xf32> to vector<128x256xf32>
      %23 = arith.addf %20, %22 : vector<128x256xf32>
      %cst_23 = arith.constant 0.000000e+00 : f32
      %24 = vector.broadcast %cst_23 : f32 to vector<128x256xf32>
      %25 = arith.maximumf %23, %24 : vector<128x256xf32>
      %c0_24 = arith.constant 0 : index
      %c0_25 = arith.constant 0 : index
      %26 = vector.load %arg9[%c0_24, %c0_25] : memref<128x256xf32, #tpu.memory_space<vmem>>, vector<128x256xf32>
      tpu.vector_store %arg9[%c0_24, %c0_25], %25 {strides = array<i32>} : memref<128x256xf32, #tpu.memory_space<vmem>>, vector<128x256xf32>,
      %c0_26 = arith.constant 0 : index
      %c256 = arith.constant 256 : index
      %27 = vector.load %arg10[%c0_26, %c256] : memref<128x512xf32, #tpu.memory_space<vmem>>, vector<128x256xf32>
      tpu.vector_store %arg10[%c0_26, %c256], %25 {strides = array<i32>} : memref<128x512xf32, #tpu.memory_space<vmem>>, vector<128x256xf32>,
    } else {
    }
    %c0 = arith.constant 0 : index
    %c0_1 = arith.constant 0 : index
    %3 = vector.load %arg9[%c0, %c0_1] : memref<128x256xf32, #tpu.memory_space<vmem>>, vector<128x256xf32>
    %c0_2 = arith.constant 0 : index
    %c0_3 = arith.constant 0 : index
    %4 = vector.load %arg2[%c0_2, %c0_3] : memref<128x128xf32, #tpu.memory_space<vmem>>, vector<128x128xf32>
    %cst = arith.constant dense<0.000000e+00> : vector<128x256xf32>
    %5 = tpu.matmul %4, %3, %cst {dimension_numbers = #tpu.dot_dimension_numbers<[1], [0], [0], [1], [0, 0, 1, 1], [], []>} : vector<128x128xf32>, vector<128x256xf32>, vector<128x256xf32> -> vector<128x256xf32>
    %c0_4 = arith.constant 0 : index
    %c0_5 = arith.constant 0 : index
    %6 = vector.load %arg10[%c0_4, %c0_5] : memref<128x512xf32, #tpu.memory_space<vmem>>, vector<128x256xf32>
    tpu.vector_store %arg10[%c0_4, %c0_5], %5 {strides = array<i32>} : memref<128x512xf32, #tpu.memory_space<vmem>>, vector<128x256xf32>,
    %c0_6 = arith.constant 0 : index
    %c0_7 = arith.constant 0 : index
    %7 = vector.load %arg10[%c0_6, %c0_7] : memref<128x512xf32, #tpu.memory_space<vmem>>, vector<128x512xf32>
    %c0_8 = arith.constant 0 : index
    %c0_9 = arith.constant 0 : index
    %c0_10 = arith.constant 0 : index
    %8 = vector.load %arg5[%c0_8, %c0_9, %c0_10] : memref<1x512x256xf32, #tpu.memory_space<vmem>>, vector<1x512x256xf32>
    %9 = vector.shape_cast %8 : vector<1x512x256xf32> to vector<512x256xf32>
    %cst_11 = arith.constant dense<0.000000e+00> : vector<128x256xf32>
    %10 = tpu.matmul %7, %9, %cst_11 {dimension_numbers = #tpu.dot_dimension_numbers<[1], [0], [0], [1], [0, 0, 1, 1], [], []>} : vector<128x512xf32>, vector<512x256xf32>, vector<128x256xf32> -> vector<128x256xf32>
    %11 = arith.addf %10, %3 : vector<128x256xf32>
    %cst_12 = arith.constant 0.000000e+00 : f32
    %12 = vector.broadcast %cst_12 : f32 to vector<128x256xf32>
    %13 = arith.maximumf %11, %12 : vector<128x256xf32>
    %c0_13 = arith.constant 0 : index
    %c0_14 = arith.constant 0 : index
    %14 = vector.load %arg9[%c0_13, %c0_14] : memref<128x256xf32, #tpu.memory_space<vmem>>, vector<128x256xf32>
    tpu.vector_store %arg9[%c0_13, %c0_14], %13 {strides = array<i32>} : memref<128x256xf32, #tpu.memory_space<vmem>>, vector<128x256xf32>,
    %c7_i32 = arith.constant 7 : i32
    %15 = arith.cmpi eq, %arg0, %c7_i32 : i32
    %16 = arith.extui %15 : i1 to i32
    %c0_i32_15 = arith.constant 0 : i32
    %17 = arith.cmpi ne, %16, %c0_i32_15 : i32
    scf.if %17 {
      %c0_16 = arith.constant 0 : index
      %c0_17 = arith.constant 0 : index
      %18 = vector.load %arg6[%c0_16, %c0_17] : memref<256x128xf32, #tpu.memory_space<vmem>>, vector<256x128xf32>
      %cst_18 = arith.constant dense<0.000000e+00> : vector<128x128xf32>
      %19 = tpu.matmul %13, %18, %cst_18 {dimension_numbers = #tpu.dot_dimension_numbers<[1], [0], [0], [1], [0, 0, 1, 1], [], []>} : vector<128x256xf32>, vector<256x128xf32>, vector<128x128xf32> -> vector<128x128xf32>
      %c0_19 = arith.constant 0 : index
      %c0_20 = arith.constant 0 : index
      %20 = vector.load %arg7[%c0_19, %c0_20] : memref<1x128xf32, #tpu.memory_space<vmem>>, vector<1x128xf32>
      %21 = vector.broadcast %20 : vector<1x128xf32> to vector<128x128xf32>
      %22 = arith.addf %19, %21 : vector<128x128xf32>
      %c0_21 = arith.constant 0 : index
      %c0_22 = arith.constant 0 : index
      %23 = vector.load %arg8[%c0_21, %c0_22] : memref<128x128xf32, #tpu.memory_space<vmem>>, vector<128x128xf32>
      tpu.vector_store %arg8[%c0_21, %c0_22], %22 {strides = array<i32>} : memref<128x128xf32, #tpu.memory_space<vmem>>, vector<128x128xf32>,
    } else {
    }
    return
  }
  func.func @transform_0(%arg0: i32) -> (i32, i32) {
    %c0_i32 = arith.constant 0 : i32
    %c0_i32_0 = arith.constant 0 : i32
    %c0_i32_1 = arith.constant 0 : i32
    return %c0_i32, %c0_i32_0 : i32, i32
  }
  func.func @transform_1(%arg0: i32) -> (i32, i32) {
    %c0_i32 = arith.constant 0 : i32
    %c0_i32_0 = arith.constant 0 : i32
    %c0_i32_1 = arith.constant 0 : i32
    return %c0_i32, %c0_i32_0 : i32, i32
  }
  func.func @transform_2(%arg0: i32) -> (i32, i32) {
    %c0_i32 = arith.constant 0 : i32
    %c0_i32_0 = arith.constant 0 : i32
    %c0_i32_1 = arith.constant 0 : i32
    return %c0_i32, %c0_i32_0 : i32, i32
  }
  func.func @transform_3(%arg0: i32) -> (i32, i32) {
    %c0_i32 = arith.constant 0 : i32
    %c0_i32_0 = arith.constant 0 : i32
    %c0_i32_1 = arith.constant 0 : i32
    return %c0_i32, %c0_i32_0 : i32, i32
  }
  func.func @transform_4(%arg0: i32) -> (i32, i32, i32) {
    %c0_i32 = arith.constant 0 : i32
    %c0_i32_0 = arith.constant 0 : i32
    %c0_i32_1 = arith.constant 0 : i32
    return %arg0, %c0_i32, %c0_i32_0 : i32, i32, i32
  }
  func.func @transform_5(%arg0: i32) -> (i32, i32) {
    %c0_i32 = arith.constant 0 : i32
    %c0_i32_0 = arith.constant 0 : i32
    %c0_i32_1 = arith.constant 0 : i32
    return %c0_i32, %c0_i32_0 : i32, i32
  }
  func.func @transform_6(%arg0: i32) -> (i32, i32) {
    %c0_i32 = arith.constant 0 : i32
    %c0_i32_0 = arith.constant 0 : i32
    %c0_i32_1 = arith.constant 0 : i32
    return %c0_i32, %c0_i32_0 : i32, i32
  }
  func.func @transform_7(%arg0: i32) -> (i32, i32) {
    %c0_i32 = arith.constant 0 : i32
    %c0_i32_0 = arith.constant 0 : i32
    %c0_i32_1 = arith.constant 0 : i32
    return %c0_i32, %c0_i32_0 : i32, i32
  }
}

</mosaic_0001>

<bundles_post_ra>
// kernel: gcnii_forward.1
= control target key start
LH: loop header
LB: loop body
LE: loop exit
PB: predicated region body
PF: predicated region fallthrough
CT: control target
= control target key end

     0   :  { %12 = vsyncpa [#allocation5], 0  ;;  %s3597_s0 = inlined_call_operand.vmem [shape: f32[128,128], index: 0, kind: input, shape index: {}]   ;;  %s3598_s1 = inlined_call_operand.hbm [shape: f32[128,128], index: 1, kind: input, shape index: {}]   ;;  %s3599_s2 = inlined_call_operand.hbm [shape: f32[128,256], index: 2, kind: input, shape index: {}]   ;;  %s3600_s3 = inlined_call_operand.hbm [shape: f32[1,256], index: 3, kind: input, shape index: {}]   ;;  %s3601_s4 = inlined_call_operand.hbm [shape: f32[8,512,256], index: 4, kind: input, shape index: {}]   ;;  %s3602_s5 = inlined_call_operand.hbm [shape: f32[256,128], index: 5, kind: input, shape index: {}]   ;;  %s3603_s6 = inlined_call_operand.hbm [shape: f32[1,128], index: 6, kind: input, shape index: {}]   ;;  %s3604_s7 = inlined_call_operand.vmem [shape: f32[128,128], index: 7, kind: output, shape index: {}]  }
   0x1   :  { %13 = vsyncpa [#allocation7], 0 }
   0x2   :  { %14 = vsyncpa [#allocation10], 0 }
   0x3   :  { %16 = vsyncpa [#allocation10 + $0x1], 0 }
   0x4   :  { %17 = vsyncpa [#allocation13], 0  ;;  %s2644_s24 = smov 0   ;;  %s2646_s25 = smov 0  }
   0x5   :  { %s2648_s26 = smov 0   ;;  %s2650_s27 = smov 0  }
   0x6 LB: > { %s2663_s28 = sadd.s32 4294967295, %s2590_s27   ;;  %p127_p0 = scmp.ne.s32.totalorder %s2582_s25, %s2578_s24  ;;  %s2590_s27 = sphi %s2650_s27, %s3659_s27   ;;  %s2586_s26 = sphi %s2648_s26, %s3658_s26   ;;  %s2582_s25 = sphi %s2646_s25, %s3657_s25   ;;  %s2578_s24 = sphi %s2644_s24, %s3656_s24  }
   0x7   : > { %p3605_p1 = scmp.eq.s32.totalorder %s2663_s28, 0  ;;  %p1787_p2 = scmp.ge.s32.totalorder %s2590_s27, 1 }
   0x8   : > { %p201_p3 = scmp.lt.s32.totalorder %s2590_s27, 9  ;;  %s2592_s8 = smov [#allocation6]  }
   0x9   : > { %p2672_p5 = por %p3605_p1, %p127_p0  ;;  %s229_s9 = sshll.u32 %s2592_s8, 4  ;;  %s230_s9 = int_to_ptr.vmem [resolvable:$true] %s229_s9 }
   0xa   : > { %p2676_p6 = pnand %p1787_p2, %p201_p3  ;;  %s2593_s11 = smov [#allocation11]  }
   0xb   : > { %s3624_s29 = scalar_select %p2672_p5, 1, 0 }
   0xc   : > { %s3625_s30 = scalar_select %p2676_p6, 1, 0 }
   0xd   : > { %p2264_p7 = pneg %p2676_p6  ;;  %s253_s12 = sshll.u32 %s2593_s11, 4  ;;  %s254_s12 = int_to_ptr.vmem [resolvable:$true] %s253_s12 }
   0xe   : > { %s2370_s15 = scalar_lea.hbm %s3599_s2, 4096 }
   0xf   : > { %p2684_p8 = pnand %p2264_p7, %p3605_p1  ;;  %p2371_p9 = scmp.ne.s32.totalorder %s3599_s2, %s2370_s15 }
  0x10   : > { %p2377_p13 = scmp.lt.u32.totalorder %s2370_s15, %s3599_s2 }
  0x11   : > { %p2696_p10 = pneg %p2684_p8 }
  0x13   : > { %p2373_p11 = pnand %p2696_p10, %p2371_p9 }
  0x15   : > { %p2374_p12 = pneg %p2373_p11 }
  0x17   : > { %p2379_p0 = pnand %p2377_p13, %p2374_p12 }
  0x19   : > { %2382 = shalt.err (!%p2379_p0)
}
  0x1a   : > { %s2383_s21 = scalar_lea.vmem %s230_s9, 4096  ;;  %p2391_p4 = scmp.lt.s32.totalorder %s230_s9, %s230_s9 }
  0x1b   : > { %p2384_p2 = scmp.ne.s32.totalorder %s230_s9, %s2383_s21  ;;  %p2392_p1 = scmp.lt.s32.totalorder %s2383_s21, %s2383_s21 }
  0x1d   : > { %p2386_p3 = pnand %p2384_p2, %p2696_p10  ;;  %p2393_p5 = por %p2392_p1, %p2391_p4 }
  0x1f   : > { %p2387_p7 = pneg %p2386_p3 }
  0x21   : > { %p2394_p6 = pnand %p2393_p5, %p2387_p7 }
  0x23   : > { %2397 = shalt.err (!%p2394_p6)
}
  0x24   : > { %s3608_s22 = smov 256   ;;  %s3609_s23 = smov 16  }
  0x25   : > { %2270 = dma.hbm_to_vmem [thread:$0]  (!%p2684_p8), %s3599_s2, 4096, %s230_s9, [#allocation7], %s3608_s22, %s3608_s22, %s3609_s23  }
  0x26   : > { %s2596_s11 = smov [#allocation4]   ;;  %s2398_s16 = scalar_lea.hbm %s3602_s5, 4096 }
  0x27   : > { %s216_s13 = sshll.u32 %s2596_s11, 4  ;;  %p2399_p1 = scmp.ne.s32.totalorder %s3602_s5, %s2398_s16  ;;  %s217_s13 = int_to_ptr.vmem [resolvable:$true] %s216_s13 }
  0x28   : > { %p2405_p6 = scmp.lt.u32.totalorder %s2398_s16, %s3602_s5 }
  0x29   : > { %p2401_p4 = pnand %p2399_p1, %p2696_p10 }
  0x2b   : > { %p2402_p5 = pneg %p2401_p4 }
  0x2d   : > { %p2407_p9 = pnand %p2405_p6, %p2402_p5 }
  0x2f   : > { %2410 = shalt.err (!%p2407_p9)
}
  0x30   : > { %s2411_s9 = scalar_lea.vmem %s254_s12, 4096  ;;  %p2419_p0 = scmp.lt.s32.totalorder %s254_s12, %s254_s12 }
  0x31   : > { %p2412_p11 = scmp.ne.s32.totalorder %s254_s12, %s2411_s9  ;;  %p2420_p2 = scmp.lt.s32.totalorder %s2411_s9, %s2411_s9 }
  0x33   : > { %p2414_p12 = pnand %p2412_p11, %p2696_p10  ;;  %p2421_p3 = por %p2420_p2, %p2419_p0 }
  0x35   : > { %p2415_p13 = pneg %p2414_p12 }
  0x37   : > { %p2422_p7 = pnand %p2421_p3, %p2415_p13 }
  0x39   : > { %2425 = shalt.err (!%p2422_p7)
}
  0x3a   : > { %s2597_s24 = smov 128   ;;  %s2598_s8 = smov 8  }
  0x3b   : > { %2276 = dma.hbm_to_vmem [thread:$0]  (!%p2684_p8), %s3602_s5, 4096, %s254_s12, [#allocation10], %s2597_s24, %s2597_s24, %s2598_s8  }
  0x3c   : > { %s2426_s17 = scalar_lea.hbm %s3598_s1, 2048 }
  0x3d   : > { %p2427_p1 = scmp.ne.s32.totalorder %s3598_s1, %s2426_s17  ;;  %p2433_p6 = scmp.lt.u32.totalorder %s2426_s17, %s3598_s1 }
  0x3f   : > { %p2429_p4 = pnand %p2427_p1, %p2696_p10 }
  0x41   : > { %p2430_p5 = pneg %p2429_p4 }
  0x43   : > { %p2435_p9 = pnand %p2433_p6, %p2430_p5 }
  0x45   : > { %2438 = shalt.err (!%p2435_p9)
}
  0x46   : > { %s2439_s11 = scalar_lea.vmem %s217_s13, 2048  ;;  %p2447_p0 = scmp.lt.s32.totalorder %s217_s13, %s217_s13 }
  0x47   : > { %p2440_p11 = scmp.ne.s32.totalorder %s217_s13, %s2439_s11  ;;  %p2448_p2 = scmp.lt.s32.totalorder %s2439_s11, %s2439_s11 }
  0x49   : > { %p2442_p12 = pnand %p2440_p11, %p2696_p10  ;;  %p2449_p3 = por %p2448_p2, %p2447_p0 }
  0x4b   : > { %p2443_p13 = pneg %p2442_p12 }
  0x4d   : > { %p2450_p7 = pnand %p2449_p3, %p2443_p13 }
  0x4f   : > { %2453 = shalt.err (!%p2450_p7)
}
  0x50   : > { %2267 = dma.hbm_to_vmem [thread:$0]  (!%p2684_p8), %s3598_s1, 2048, %s217_s13, [#allocation5], %s2597_s24, %s2597_s24, %s2598_s8  }
  0x51   : > { %s2599_s15 = smov [#allocation8]   ;;  %s2600_s17 = smov [#allocation12]  }
  0x52   : > { %s243_s16 = sshll.u32 %s2599_s15, 4  ;;  %s267_s19 = sshll.u32 %s2600_s17, 4  ;;  %s244_s16 = int_to_ptr.vmem [resolvable:$true] %s243_s16  ;;  %s268_s19 = int_to_ptr.vmem [resolvable:$true] %s267_s19 }
  0x53   : > { %s2454_s9 = scalar_lea.hbm %s3600_s3, 32 }
  0x54   : > { %p2455_p1 = scmp.ne.s32.totalorder %s3600_s3, %s2454_s9  ;;  %p2461_p6 = scmp.lt.u32.totalorder %s2454_s9, %s3600_s3 }
  0x56   : > { %p2457_p4 = pnand %p2455_p1, %p2696_p10 }
  0x58   : > { %p2458_p5 = pneg %p2457_p4 }
  0x5a   : > { %p2463_p9 = pnand %p2461_p6, %p2458_p5 }
  0x5c   : > { %2466 = shalt.err (!%p2463_p9)
}
  0x5d   : > { %s2467_s13 = scalar_lea.vmem %s244_s16, 32  ;;  %p2475_p0 = scmp.lt.s32.totalorder %s244_s16, %s244_s16 }
  0x5e   : > { %p2468_p11 = scmp.ne.s32.totalorder %s244_s16, %s2467_s13  ;;  %p2476_p2 = scmp.lt.s32.totalorder %s2467_s13, %s2467_s13 }
  0x60   : > { %p2470_p12 = pnand %p2468_p11, %p2696_p10  ;;  %p2477_p3 = por %p2476_p2, %p2475_p0 }
  0x62   : > { %p2471_p13 = pneg %p2470_p12 }
  0x64   : > { %p2478_p7 = pnand %p2477_p3, %p2471_p13 }
  0x66   : > { %2481 = shalt.err (!%p2478_p7)
}
  0x67   : > { %2273 = dma.hbm_to_vmem [thread:$0]  (!%p2684_p8), %s3600_s3, 32, %s244_s16, [#allocation7]  }
  0x68   : > { %s2482_s14 = scalar_lea.hbm %s3603_s6, 16 }
  0x69   : > { %p2483_p1 = scmp.ne.s32.totalorder %s3603_s6, %s2482_s14  ;;  %p2489_p6 = scmp.lt.u32.totalorder %s2482_s14, %s3603_s6 }
  0x6b   : > { %p2485_p4 = pnand %p2483_p1, %p2696_p10 }
  0x6d   : > { %p2486_p5 = pneg %p2485_p4 }
  0x6f   : > { %p2491_p9 = pnand %p2489_p6, %p2486_p5 }
  0x71   : > { %2494 = shalt.err (!%p2491_p9)
}
  0x72   : > { %s2495_s9 = scalar_lea.vmem %s268_s19, 16  ;;  %s2502_s16 = scalar_lea.vmem %s268_s19, 32 }
  0x73   : > { %p2496_p11 = scmp.ne.s32.totalorder %s268_s19, %s2495_s9  ;;  %p2503_p0 = scmp.lt.s32.totalorder %s268_s19, %s268_s19 }
  0x74   : > { %p2504_p2 = scmp.lt.s32.totalorder %s2502_s16, %s2495_s9 }
  0x75   : > { %p2498_p12 = pnand %p2496_p11, %p2696_p10 }
  0x76   : > { %p2505_p3 = por %p2504_p2, %p2503_p0 }
  0x77   : > { %p2499_p13 = pneg %p2498_p12 }
  0x79   : > { %p2506_p7 = pnand %p2505_p3, %p2499_p13 }
  0x7b   : > { %2509 = shalt.err (!%p2506_p7)
}
  0x7c   : > { %2279 = dma.hbm_to_vmem [thread:$0]  (!%p2684_p8), %s3603_s6, 16, %s268_s19, [#allocation13]  }
  0x7d   : > { %s2788_s18 = sadd.s32 1, %s2590_s27   ;;  %s114_s10 = sadd.s32 1, %s2586_s26 }
  0x7e   : > { %s111_s13 = ssub.s32 %s2590_s27, %s2788_s18  ;;  %p121_p1 = scmp.ne.s32.totalorder %s2586_s26, %s2582_s25 }
  0x7f   : > { %p112_p10 = scmp.eq.s32.totalorder %s111_s13, 0  ;;  %p122_p4 = scmp.eq.s32.totalorder %s2590_s27, 0 }
  0x80   : > { %p2289_p5 = scmp.lt.s32.totalorder %s2590_s27, 8  ;;  %s278_s24 = sand.u32 1, %s2590_s27  }
  0x81   : > { %s2798_s22 = scalar_select %p112_p10, %s2586_s26, %s114_s10  }
  0x82   : > { %p123_p6 = por %p122_p4, %p121_p1  ;;  %s280_s23 = sand.u32 1, %s2586_s26  }
  0x83   : > { %s1794_s8 = sshll.u32 %s280_s23, 10  ;;  %s1809_s14 = sshll.u32 %s2590_s27, 14 }
  0x84   : > { %s2806_s19 = scalar_lea.hbm %s3601_s4, %s1809_s14  ;;  %s282_s20 = scalar_lea.vmem [#allocation9], %s1794_s8 }
  0x85   : > { %s289_s21 = sshll.u32 %s282_s20, 4  ;;  %p2808_p8 = pnand %p2289_p5, %p123_p6  ;;  %s2812_s21 = int_to_ptr.vmem [resolvable:$true] %s289_s21 }
  0x86   : > { %s2814_s27 = scalar_lea.sflag [#allocation10], %s278_s24  ;;  %s2510_s16 = scalar_lea.hbm %s2806_s19, 16384 }
  0x87   : > { %p2511_p9 = scmp.ne.s32.totalorder %s2806_s19, %s2510_s16  ;;  %p2512_p11 = pneg %p2808_p8 }
  0x88   : > { %s2515_s13 = scalar_lea.hbm %s3601_s4, 131072  ;;  %p2516_p0 = scmp.lt.u32.totalorder %s2806_s19, %s3601_s4 }
  0x89   : > { %p2513_p12 = pnand %p2512_p11, %p2511_p9  ;;  %p2517_p2 = scmp.lt.u32.totalorder %s2515_s13, %s2510_s16 }
  0x8a   : > { %p2519_p7 = scmp.lt.u32.totalorder %s2510_s16, %s2806_s19 }
  0x8b   : > { %p2514_p13 = pneg %p2513_p12  ;;  %p2518_p3 = por %p2517_p2, %p2516_p0 }
  0x8d   : > { %p2520_p10 = por %p2519_p7, %p2518_p3 }
  0x8f   : > { %p2521_p1 = pnand %p2520_p10, %p2514_p13 }
  0x91   : > { %2524 = shalt.err (!%p2521_p1)
}
  0x92   : > { %s2525_s24 = scalar_lea.vmem %s2812_s21, 16384  ;;  %s2601_s8 = smov [#allocation9]  }
  0x93   : > { %p2526_p4 = scmp.ne.s32.totalorder %s2812_s21, %s2525_s24  ;;  %s2530_s14 = sshll.u32 %s2601_s8, 4  ;;  %s2531_s14 = int_to_ptr.vmem [resolvable:$false] %s2530_s14 }
  0x94   : > { %s2532_s15 = scalar_lea.vmem %s2531_s14, 32768  ;;  %p2533_p9 = scmp.lt.s32.totalorder %s2812_s21, %s2531_s14 }
  0x95   : > { %p2528_p5 = pnand %p2526_p4, %p2512_p11  ;;  %p2534_p12 = scmp.lt.s32.totalorder %s2532_s15, %s2525_s24 }
  0x97   : > { %p2529_p6 = pneg %p2528_p5  ;;  %p2535_p0 = por %p2534_p12, %p2533_p9 }
  0x99   : > { %p2536_p2 = pnand %p2535_p0, %p2529_p6 }
  0x9b   : > { %2539 = shalt.err (!%p2536_p2)
}
  0x9c   : > { %s3629_s17 = smov 16   ;;  %s3630_s20 = smov 256  }
  0x9d   : > { %2283 = dma.hbm_to_vmem [thread:$0]  (!%p2808_p8), %s2806_s19, 16384, %s2812_s21, %s2814_s27, %s3630_s20, %s3630_s20, %s3629_s17  }
  0x9e   : > { %p3631_p11 = scmp.ne.s32.totalorder %s3625_s30, 0 }
  0x9f   : > { %p3632_p13 = scmp.eq.s32.totalorder (!%p3631_p11), %s2663_s28, 0 }
  0xa0   : > { %301 = sbr.rel (%p3631_p11) target bundleno = 1287 (0x507), region = 48 }
  0xa7   : > { %2557 = dma.done.wait (%p3632_p13), [#allocation5], 2048   ;;  %p3633_p3 = pmov %p3632_p13 }
  0xa9   : > { %2559 = vsyncadd (%p3633_p3), [#allocation5], 4294965248  ;;  %p3634_p7 = pmov %p3633_p3 }
  0xaa   : > { %p3635_p10 = pmov %p3633_p3 }
  0xab   : > { %2561 = dma.done.wait (%p3634_p7), [#allocation7], 4128  }
  0xac   : > { %2563 = vsyncadd (%p3635_p10), [#allocation7], 4294963168  ;;  %s315_s9 = sand.u32 1, %s2663_s28   ;;  %s317_s19 = sand.u32 1, %s2582_s25  }
  0xad   : > { %s1801_s21 = sshll.u32 %s317_s19, 10  ;;  %s316_s30 = scalar_lea.sflag [#allocation10], %s315_s9 }
  0xae   : > { %s2857_s27 = scalar_lea.vmem [#allocation9], %s1801_s21  ;;  %p3636_p8 = scmp.ne.s32.totalorder %s3624_s29, 0 }
  0xb0   : > { %2565 = dma.done.wait (%p3636_p8), %s316_s30, 16384  }
  0xb1   : > { %2567 = vsyncadd (%p3636_p8), %s316_s30, 4294950912  ;;  %p3637_p1 = pmov %p3633_p3 }
  0xb3   : > { %2569 = dma.done.wait (%p3637_p1), [#allocation10], 4096   ;;  %p3638_p4 = pmov %p3637_p1 }
  0xb4   : > { %p3639_p5 = pmov %p3637_p1 }
  0xb5   : > { %2571 = vsyncadd (%p3638_p4), [#allocation10], 4294963200 }
  0xb6   : > { %2573 = dma.done.wait (%p3639_p5), [#allocation13], 16   ;;  %p3640_p6 = pmov %p3637_p1 }
  0xb7   : > { %p3641_p9 = scmp.ne.s32.totalorder %s2663_s28, 0 }
  0xb8   : > { %2575 = vsyncadd (%p3640_p6), [#allocation13], 4294967280  ;;  %v374_v0 = vld [vmem:[#allocation6 + $0x8] sm:$0xff] (!%p3641_p9)  ;;  %v376_v1 = vld [vmem:[#allocation6 + $0x18] sm:$0xff] (!%p3641_p9)  ;;  %v2602_v7 = vmov (!%p3641_p9), 0.0  }
  0xb9   : > { %356 = sbr.rel (%p3641_p9) target bundleno = 467 (0x1d3), region = 76  ;;  %v373_v2 = vld [vmem:[#allocation6] sm:$0xff] (!%p3641_p9)  ;;  %v1890_v3 = vpack.c.bf16 (!%p3641_p9), %v376_v1, %v374_v0  ;;  %v375_v4 = vld [vmem:[#allocation6 + $0x10] sm:$0xff] (!%p3641_p9)  ;;  %v378_v5 = vld [vmem:[#allocation6 + $0x28] sm:$0xff] (!%p3641_p9)  ;;  %481 = vmatprep.mubr.f32.mxu0 (!%p3641_p9), %v2602_v7  ;;  %529 = vmatprep.mubr.f32.mxu1 (!%p3641_p9), %v2602_v7  ;;  %v407_v1 = vlaneseq (!%p3641_p9) }
  0xba   : > { %v380_v6 = vld [vmem:[#allocation6 + $0x38] sm:$0xff] (!%p3641_p9)  ;;  %v1892_v8 = vpack.c.bf16 (!%p3641_p9), %v375_v4, %v373_v2  ;;  %v377_v10 = vld [vmem:[#allocation6 + $0x20] sm:$0xff] (!%p3641_p9)  ;;  %v379_v11 = vld [vmem:[#allocation6 + $0x30] sm:$0xff] (!%p3641_p9) }
  0xbb   : > { %v1894_v9 = vpack.c.bf16 (!%p3641_p9), %v380_v6, %v378_v5  ;;  %v382_v12 = vld [vmem:[#allocation6 + $0x48] sm:$0xff] (!%p3641_p9)  ;;  %1891 = vmatprep.subr.bf16.mxu0 (!%p3641_p9), %v1890_v3  ;;  %2114 = vmatprep.subr.bf16.mxu1 (!%p3641_p9), %v1890_v3  ;;  %v384_v13 = vld [vmem:[#allocation6 + $0x58] sm:$0xff] (!%p3641_p9)  ;;  %v1896_v14 = vpack.c.bf16 (!%p3641_p9), %v379_v11, %v377_v10  ;;  %v381_v16 = vld [vmem:[#allocation6 + $0x40] sm:$0xff] (!%p3641_p9)  ;;  %v408_v2 = vshrl.u32 (!%p3641_p9), %v407_v1, 7 }
  0xbc   : > { %1893 = vmatpush1.bf16.msra.mxu0 (!%p3641_p9), %v1892_v8  ;;  %2122 = vmatpush1.bf16.msra.mxu1 (!%p3641_p9), %v1892_v8  ;;  %v1898_v15 = vpack.c.bf16 (!%p3641_p9), %v384_v13, %v382_v12  ;;  %v383_v17 = vld [vmem:[#allocation6 + $0x50] sm:$0xff] (!%p3641_p9)  ;;  %v386_v18 = vld [vmem:[#allocation6 + $0x68] sm:$0xff] (!%p3641_p9)  ;;  %v388_v19 = vld [vmem:[#allocation6 + $0x78] sm:$0xff] (!%p3641_p9) }
  0xbd   : > { %1895 = vmatprep.subr.bf16.mxu0 (!%p3641_p9), %v1894_v9  ;;  %2115 = vmatprep.subr.bf16.mxu1 (!%p3641_p9), %v1894_v9  ;;  %v1900_v20 = vpack.c.bf16 (!%p3641_p9), %v383_v17, %v381_v16  ;;  %v1902_v21 = vpack.c.bf16 (!%p3641_p9), %v388_v19, %v386_v18  ;;  %v385_v22 = vld [vmem:[#allocation6 + $0x60] sm:$0xff] (!%p3641_p9)  ;;  %v387_v23 = vld [vmem:[#allocation6 + $0x70] sm:$0xff] (!%p3641_p9)  ;;  %v390_v24 = vld [vmem:[#allocation6 + $0x88] sm:$0xff] (!%p3641_p9)  ;;  %v409_v3 = vsub.s32 (!%p3641_p9), 0, %v408_v2  ;;  %v413_v5 = vsub.s32 (!%p3641_p9), 1, %v408_v2 }
  0xbe   : > { %v392_v25 = vld [vmem:[#allocation6 + $0x98] sm:$0xff] (!%p3641_p9)  ;;  %v1904_v26 = vpack.c.bf16 (!%p3641_p9), %v387_v23, %v385_v22  ;;  %v389_v28 = vld [vmem:[#allocation6 + $0x80] sm:$0xff] (!%p3641_p9)  ;;  %v391_v29 = vld [vmem:[#allocation6 + $0x90] sm:$0xff] (!%p3641_p9) }
  0xbf   : > { %v1906_v27 = vpack.c.bf16 (!%p3641_p9), %v392_v25, %v390_v24  ;;  %v394_v30 = vld [vmem:[#allocation6 + $0xa8] sm:$0xff] (!%p3641_p9)  ;;  %v396_v31 = vld [vmem:[#allocation6 + $0xb8] sm:$0xff] (!%p3641_p9)  ;;  %v1908_v32 = vpack.c.bf16 (!%p3641_p9), %v391_v29, %v389_v28  ;;  %v393_v34 = vld [vmem:[#allocation6 + $0xa0] sm:$0xff] (!%p3641_p9) }
  0xc0   : > { %1897 = vmatpush1.bf16.msra.mxu0 %v1896_v14  ;;  %2123 = vmatpush1.bf16.msra.mxu1 %v1896_v14  ;;  %v1910_v33 = vpack.c.bf16 %v396_v31, %v394_v30  ;;  %v395_v35 = vld [vmem:[#allocation6 + $0xb0] sm:$0xff]  ;;  %v398_v36 = vld [vmem:[#allocation6 + $0xc8] sm:$0xff]  ;;  %v400_v37 = vld [vmem:[#allocation6 + $0xd8] sm:$0xff] }
  0xc1   : > { %1899 = vmatprep.subr.bf16.mxu0 %v1898_v15  ;;  %2116 = vmatprep.subr.bf16.mxu1 %v1898_v15  ;;  %v1912_v38 = vpack.c.bf16 %v395_v35, %v393_v34  ;;  %v1914_v39 = vpack.c.bf16 %v400_v37, %v398_v36  ;;  %v397_v40 = vld [vmem:[#allocation6 + $0xc0] sm:$0xff]  ;;  %v399_v41 = vld [vmem:[#allocation6 + $0xd0] sm:$0xff]  ;;  %v402_v42 = vld [vmem:[#allocation6 + $0xe8] sm:$0xff] }
  0xc2   : > { %v404_v43 = vld [vmem:[#allocation6 + $0xf8] sm:$0xff]  ;;  %v1916_v44 = vpack.c.bf16 %v399_v41, %v397_v40  ;;  %v401_v46 = vld [vmem:[#allocation6 + $0xe0] sm:$0xff]  ;;  %v403_v47 = vld [vmem:[#allocation6 + $0xf0] sm:$0xff] }
  0xc3   : > { %v1918_v45 = vpack.c.bf16 %v404_v43, %v402_v42  ;;  %v1920_v48 = vpack.c.bf16 %v403_v47, %v401_v46  ;;  %v357_v49 = vld [vmem:[%s3597_s0] sm:$0xff]  ;;  %v358_v51 = vld [vmem:[%s3597_s0 + $0x8] sm:$0xff]  ;;  %v359_v53 = vld [vmem:[%s3597_s0 + $0x10] sm:$0xff] }
  0xc4   : > { %1901 = vmatpush1.bf16.msra.mxu0 %v1900_v20  ;;  %2124 = vmatpush1.bf16.msra.mxu1 %v1900_v20  ;;  %v365_v50 = vld [vmem:[%s3597_s0 + $0x40] sm:$0xff]  ;;  %v366_v52 = vld [vmem:[%s3597_s0 + $0x48] sm:$0xff]  ;;  %v367_v54 = vld [vmem:[%s3597_s0 + $0x50] sm:$0xff] }
  0xc5   : > { %1903 = vmatprep.subr.bf16.mxu0 %v1902_v21  ;;  %2117 = vmatprep.subr.bf16.mxu1 %v1902_v21  ;;  %v360_v55 = vld [vmem:[%s3597_s0 + $0x18] sm:$0xff]  ;;  %v361_v57 = vld [vmem:[%s3597_s0 + $0x20] sm:$0xff]  ;;  %v362_v59 = vld [vmem:[%s3597_s0 + $0x28] sm:$0xff] }
  0xc6   : > { %v368_v56 = vld [vmem:[%s3597_s0 + $0x58] sm:$0xff]  ;;  %v369_v58 = vld [vmem:[%s3597_s0 + $0x60] sm:$0xff]  ;;  %v370_v60 = vld [vmem:[%s3597_s0 + $0x68] sm:$0xff] }
  0xc7   : > { %v363_v61 = vld [vmem:[%s3597_s0 + $0x30] sm:$0xff]  ;;  %v364_v63 = vld [vmem:[%s3597_s0 + $0x38] sm:$0xff]  ;;  %v405_v4 = vld [vmem:[#allocation8] sm:$0x3] }
  0xc8   : > { %1905 = vmatpush1.bf16.msra.mxu0 %v1904_v26  ;;  %2125 = vmatpush1.bf16.msra.mxu1 %v1904_v26  ;;  %v371_v62 = vld [vmem:[%s3597_s0 + $0x70] sm:$0xff]  ;;  %v372_v0 = vld [vmem:[%s3597_s0 + $0x78] sm:$0xff]  ;;  %v2937_v6 = vrot.slane %v405_v4, %v409_v3  ;;  %v2939_v8 = vrot.slane %v405_v4, %v413_v5 }
  0xc9   : > { %1907 = vmatprep.subr.bf16.mxu0 %v1906_v27  ;;  %2118 = vmatprep.subr.bf16.mxu1 %v1906_v27 }
  0xcc   : > { %1909 = vmatpush1.bf16.msra.mxu0 %v1908_v32  ;;  %2126 = vmatpush1.bf16.msra.mxu1 %v1908_v32 }
  0xcd   : > { %1911 = vmatprep.subr.bf16.mxu0 %v1910_v33  ;;  %2119 = vmatprep.subr.bf16.mxu1 %v1910_v33 }
  0xd0   : > { %1913 = vmatpush1.bf16.msra.mxu0 %v1912_v38  ;;  %2127 = vmatpush1.bf16.msra.mxu1 %v1912_v38 }
  0xd1   : > { %1915 = vmatprep.subr.bf16.mxu0 %v1914_v39  ;;  %2120 = vmatprep.subr.bf16.mxu1 %v1914_v39 }
  0xd4   : > { %1917 = vmatpush1.bf16.msra.mxu0 %v1916_v44  ;;  %2128 = vmatpush1.bf16.msra.mxu1 %v1916_v44 }
  0xd5   : > { %1919 = vmatprep.subr.bf16.mxu0 %v1918_v45  ;;  %2121 = vmatprep.subr.bf16.mxu1 %v1918_v45 }
  0xd8   : > { %1921 = vmatpush1.bf16.msra.mxu0 %v1920_v48  ;;  %2129 = vmatpush1.bf16.msra.mxu1 %v1920_v48 }
  0xdb   : > { %482 = vmatmul.mubr.f32.vlgmr.msra.gmra.mrb[0].mxu0 %v357_v49  ;;  %530 = vmatmul.mubr.f32.vlgmr.msra.gmra.mrb[0].mxu1 %v365_v50 }
  0xdc   : > { %487 = vmatprep.mubr.f32.mxu0 %v2602_v7  ;;  %535 = vmatprep.mubr.f32.mxu1 %v2602_v7 }
  0xdf   : > { %488 = vmatmul.mubr.f32.gmra.mrb[2].mxu0 %v358_v51  ;;  %536 = vmatmul.mubr.f32.gmra.mrb[2].mxu1 %v366_v52 }
  0xe0   : > { %493 = vmatprep.mubr.f32.mxu0 %v2602_v7  ;;  %541 = vmatprep.mubr.f32.mxu1 %v2602_v7 }
  0xe3   : > { %494 = vmatmul.mubr.f32.gmra.mrb[4].mxu0 %v359_v53  ;;  %542 = vmatmul.mubr.f32.gmra.mrb[4].mxu1 %v367_v54 }
  0xe4   : > { %499 = vmatprep.mubr.f32.mxu0 %v2602_v7  ;;  %547 = vmatprep.mubr.f32.mxu1 %v2602_v7 }
  0xe7   : > { %500 = vmatmul.mubr.f32.gmra.mrb[6].mxu0 %v360_v55  ;;  %548 = vmatmul.mubr.f32.gmra.mrb[6].mxu1 %v368_v56 }
  0xe8   : > { %505 = vmatprep.mubr.f32.mxu0 %v2602_v7  ;;  %553 = vmatprep.mubr.f32.mxu1 %v2602_v7 }
  0xeb   : > { %506 = vmatmul.mubr.f32.gmra.mrb[8].mxu0 %v361_v57  ;;  %554 = vmatmul.mubr.f32.gmra.mrb[8].mxu1 %v369_v58 }
  0xec   : > { %511 = vmatprep.mubr.f32.mxu0 %v2602_v7  ;;  %559 = vmatprep.mubr.f32.mxu1 %v2602_v7 }
  0xef   : > { %512 = vmatmul.mubr.f32.gmra.mrb[10].mxu0 %v362_v59  ;;  %560 = vmatmul.mubr.f32.gmra.mrb[10].mxu1 %v370_v60 }
  0xf0   : > { %517 = vmatprep.mubr.f32.mxu0 %v2602_v7  ;;  %565 = vmatprep.mubr.f32.mxu1 %v2602_v7 }
  0xf3   : > { %518 = vmatmul.mubr.f32.gmra.mrb[12].mxu0 %v363_v61  ;;  %566 = vmatmul.mubr.f32.gmra.mrb[12].mxu1 %v371_v62 }
  0xf4   : > { %523 = vmatprep.mubr.f32.mxu0 %v2602_v7  ;;  %571 = vmatprep.mubr.f32.mxu1 %v2602_v7 }
  0xf7   : > { %524 = vmatmul.mubr.f32.gmra.mrb[14].mxu0 %v364_v63  ;;  %572 = vmatmul.mubr.f32.gmra.mrb[14].mxu1 %v372_v0 }
 0x1ae   : > { %v483_v7 = vpop.f32.mrb[0].mxu0  ;;  %v531_v9 = vpop.f32.mrb[0].mxu1 }
 0x1af   : > { %v484_v10 = vadd.f32 %v483_v7, %v2937_v6  ;;  %v532_v11 = vadd.f32 %v531_v9, %v2937_v6  ;;  %v485_v12 = vpop.f32.mrb[1].mxu0  ;;  %v533_v13 = vpop.f32.mrb[1].mxu1 }
 0x1b0   : > { %v486_v14 = vadd.f32 %v485_v12, %v2939_v8  ;;  %v534_v15 = vadd.f32 %v533_v13, %v2939_v8 }
 0x1b1   : > { %v578_v16 = vmax.f32 %v484_v10, 0.0  ;;  %v594_v17 = vmax.f32 %v532_v11, 0.0 }
 0x1b2   : > { %v579_v18 = vmax.f32 %v486_v14, 0.0  ;;  %v595_v19 = vmax.f32 %v534_v15, 0.0  ;;  %v489_v20 = vpop.f32.mrb[2].mxu0  ;;  %v537_v21 = vpop.f32.mrb[2].mxu1 }
 0x1b3   : > { %610 = vst [vmem:[#allocation2] sm:$0xff] %v578_v16  ;;  %642 = vst [vmem:[#allocation3 + $0x10] sm:$0xff] %v578_v16  ;;  %v490_v22 = vadd.f32 %v489_v20, %v2937_v6  ;;  %v538_v23 = vadd.f32 %v537_v21, %v2937_v6  ;;  %v491_v24 = vpop.f32.mrb[3].mxu0  ;;  %v539_v25 = vpop.f32.mrb[3].mxu1 }
 0x1b4   : > { %626 = vst [vmem:[#allocation2 + $0x80] sm:$0xff] %v594_v17  ;;  %658 = vst [vmem:[#allocation3 + $0x110] sm:$0xff] %v594_v17  ;;  %v492_v26 = vadd.f32 %v491_v24, %v2939_v8  ;;  %v540_v27 = vadd.f32 %v539_v25, %v2939_v8 }
 0x1b5   : > { %611 = vst [vmem:[#allocation2 + $0x8] sm:$0xff] %v579_v18  ;;  %643 = vst [vmem:[#allocation3 + $0x18] sm:$0xff] %v579_v18  ;;  %v580_v28 = vmax.f32 %v490_v22, 0.0  ;;  %v596_v29 = vmax.f32 %v538_v23, 0.0 }
 0x1b6   : > { %627 = vst [vmem:[#allocation2 + $0x88] sm:$0xff] %v595_v19  ;;  %659 = vst [vmem:[#allocation3 + $0x118] sm:$0xff] %v595_v19  ;;  %v581_v30 = vmax.f32 %v492_v26, 0.0  ;;  %v597_v31 = vmax.f32 %v540_v27, 0.0  ;;  %v495_v32 = vpop.f32.mrb[4].mxu0  ;;  %v543_v33 = vpop.f32.mrb[4].mxu1 }
 0x1b7   : > { %612 = vst [vmem:[#allocation2 + $0x10] sm:$0xff] %v580_v28  ;;  %644 = vst [vmem:[#allocation3 + $0x30] sm:$0xff] %v580_v28  ;;  %v496_v34 = vadd.f32 %v495_v32, %v2937_v6  ;;  %v544_v35 = vadd.f32 %v543_v33, %v2937_v6  ;;  %v497_v36 = vpop.f32.mrb[5].mxu0  ;;  %v545_v37 = vpop.f32.mrb[5].mxu1 }
 0x1b8   : > { %628 = vst [vmem:[#allocation2 + $0x90] sm:$0xff] %v596_v29  ;;  %660 = vst [vmem:[#allocation3 + $0x130] sm:$0xff] %v596_v29  ;;  %v498_v38 = vadd.f32 %v497_v36, %v2939_v8  ;;  %v546_v39 = vadd.f32 %v545_v37, %v2939_v8 }
 0x1b9   : > { %613 = vst [vmem:[#allocation2 + $0x18] sm:$0xff] %v581_v30  ;;  %645 = vst [vmem:[#allocation3 + $0x38] sm:$0xff] %v581_v30  ;;  %v582_v40 = vmax.f32 %v496_v34, 0.0  ;;  %v598_v41 = vmax.f32 %v544_v35, 0.0 }
 0x1ba   : > { %629 = vst [vmem:[#allocation2 + $0x98] sm:$0xff] %v597_v31  ;;  %661 = vst [vmem:[#allocation3 + $0x138] sm:$0xff] %v597_v31  ;;  %v583_v42 = vmax.f32 %v498_v38, 0.0  ;;  %v599_v43 = vmax.f32 %v546_v39, 0.0  ;;  %v501_v44 = vpop.f32.mrb[6].mxu0  ;;  %v549_v45 = vpop.f32.mrb[6].mxu1 }
 0x1bb   : > { %614 = vst [vmem:[#allocation2 + $0x20] sm:$0xff] %v582_v40  ;;  %646 = vst [vmem:[#allocation3 + $0x50] sm:$0xff] %v582_v40  ;;  %v502_v46 = vadd.f32 %v501_v44, %v2937_v6  ;;  %v550_v47 = vadd.f32 %v549_v45, %v2937_v6  ;;  %v503_v48 = vpop.f32.mrb[7].mxu0  ;;  %v551_v49 = vpop.f32.mrb[7].mxu1 }
 0x1bc   : > { %630 = vst [vmem:[#allocation2 + $0xa0] sm:$0xff] %v598_v41  ;;  %662 = vst [vmem:[#allocation3 + $0x150] sm:$0xff] %v598_v41  ;;  %v504_v50 = vadd.f32 %v503_v48, %v2939_v8  ;;  %v552_v51 = vadd.f32 %v551_v49, %v2939_v8 }
 0x1bd   : > { %615 = vst [vmem:[#allocation2 + $0x28] sm:$0xff] %v583_v42  ;;  %647 = vst [vmem:[#allocation3 + $0x58] sm:$0xff] %v583_v42  ;;  %v584_v52 = vmax.f32 %v502_v46, 0.0  ;;  %v600_v53 = vmax.f32 %v550_v47, 0.0 }
 0x1be   : > { %631 = vst [vmem:[#allocation2 + $0xa8] sm:$0xff] %v599_v43  ;;  %663 = vst [vmem:[#allocation3 + $0x158] sm:$0xff] %v599_v43  ;;  %v585_v54 = vmax.f32 %v504_v50, 0.0  ;;  %v601_v55 = vmax.f32 %v552_v51, 0.0  ;;  %v507_v56 = vpop.f32.mrb[8].mxu0  ;;  %v555_v57 = vpop.f32.mrb[8].mxu1 }
 0x1bf   : > { %616 = vst [vmem:[#allocation2 + $0x30] sm:$0xff] %v584_v52  ;;  %648 = vst [vmem:[#allocation3 + $0x70] sm:$0xff] %v584_v52  ;;  %v508_v58 = vadd.f32 %v507_v56, %v2937_v6  ;;  %v556_v59 = vadd.f32 %v555_v57, %v2937_v6  ;;  %v509_v60 = vpop.f32.mrb[9].mxu0  ;;  %v557_v61 = vpop.f32.mrb[9].mxu1 }
 0x1c0   : > { %632 = vst [vmem:[#allocation2 + $0xb0] sm:$0xff] %v600_v53  ;;  %664 = vst [vmem:[#allocation3 + $0x170] sm:$0xff] %v600_v53  ;;  %v510_v62 = vadd.f32 %v509_v60, %v2939_v8  ;;  %v558_v63 = vadd.f32 %v557_v61, %v2939_v8 }
 0x1c1   : > { %617 = vst [vmem:[#allocation2 + $0x38] sm:$0xff] %v585_v54  ;;  %649 = vst [vmem:[#allocation3 + $0x78] sm:$0xff] %v585_v54  ;;  %v586_v0 = vmax.f32 %v508_v58, 0.0  ;;  %v602_v1 = vmax.f32 %v556_v59, 0.0 }
 0x1c2   : > { %633 = vst [vmem:[#allocation2 + $0xb8] sm:$0xff] %v601_v55  ;;  %665 = vst [vmem:[#allocation3 + $0x178] sm:$0xff] %v601_v55  ;;  %v587_v2 = vmax.f32 %v510_v62, 0.0  ;;  %v603_v3 = vmax.f32 %v558_v63, 0.0  ;;  %v513_v4 = vpop.f32.mrb[10].mxu0  ;;  %v561_v5 = vpop.f32.mrb[10].mxu1 }
 0x1c3   : > { %618 = vst [vmem:[#allocation2 + $0x40] sm:$0xff] %v586_v0  ;;  %650 = vst [vmem:[#allocation3 + $0x90] sm:$0xff] %v586_v0  ;;  %v514_v7 = vadd.f32 %v513_v4, %v2937_v6  ;;  %v562_v9 = vadd.f32 %v561_v5, %v2937_v6  ;;  %v515_v10 = vpop.f32.mrb[11].mxu0  ;;  %v563_v11 = vpop.f32.mrb[11].mxu1 }
 0x1c4   : > { %634 = vst [vmem:[#allocation2 + $0xc0] sm:$0xff] %v602_v1  ;;  %666 = vst [vmem:[#allocation3 + $0x190] sm:$0xff] %v602_v1  ;;  %v516_v12 = vadd.f32 %v515_v10, %v2939_v8  ;;  %v564_v13 = vadd.f32 %v563_v11, %v2939_v8 }
 0x1c5   : > { %619 = vst [vmem:[#allocation2 + $0x48] sm:$0xff] %v587_v2  ;;  %651 = vst [vmem:[#allocation3 + $0x98] sm:$0xff] %v587_v2  ;;  %v588_v14 = vmax.f32 %v514_v7, 0.0  ;;  %v604_v15 = vmax.f32 %v562_v9, 0.0 }
 0x1c6   : > { %635 = vst [vmem:[#allocation2 + $0xc8] sm:$0xff] %v603_v3  ;;  %667 = vst [vmem:[#allocation3 + $0x198] sm:$0xff] %v603_v3  ;;  %v589_v16 = vmax.f32 %v516_v12, 0.0  ;;  %v605_v17 = vmax.f32 %v564_v13, 0.0  ;;  %v519_v18 = vpop.f32.mrb[12].mxu0  ;;  %v567_v19 = vpop.f32.mrb[12].mxu1 }
 0x1c7   : > { %620 = vst [vmem:[#allocation2 + $0x50] sm:$0xff] %v588_v14  ;;  %652 = vst [vmem:[#allocation3 + $0xb0] sm:$0xff] %v588_v14  ;;  %v520_v20 = vadd.f32 %v519_v18, %v2937_v6  ;;  %v568_v21 = vadd.f32 %v567_v19, %v2937_v6  ;;  %v521_v22 = vpop.f32.mrb[13].mxu0  ;;  %v569_v23 = vpop.f32.mrb[13].mxu1 }
 0x1c8   : > { %636 = vst [vmem:[#allocation2 + $0xd0] sm:$0xff] %v604_v15  ;;  %668 = vst [vmem:[#allocation3 + $0x1b0] sm:$0xff] %v604_v15  ;;  %v522_v24 = vadd.f32 %v521_v22, %v2939_v8  ;;  %v570_v25 = vadd.f32 %v569_v23, %v2939_v8 }
 0x1c9   : > { %621 = vst [vmem:[#allocation2 + $0x58] sm:$0xff] %v589_v16  ;;  %653 = vst [vmem:[#allocation3 + $0xb8] sm:$0xff] %v589_v16  ;;  %v590_v26 = vmax.f32 %v520_v20, 0.0  ;;  %v606_v27 = vmax.f32 %v568_v21, 0.0 }
 0x1ca   : > { %637 = vst [vmem:[#allocation2 + $0xd8] sm:$0xff] %v605_v17  ;;  %669 = vst [vmem:[#allocation3 + $0x1b8] sm:$0xff] %v605_v17  ;;  %v591_v28 = vmax.f32 %v522_v24, 0.0  ;;  %v607_v29 = vmax.f32 %v570_v25, 0.0  ;;  %v525_v30 = vpop.f32.mrb[14].mxu0  ;;  %v573_v31 = vpop.f32.mrb[14].mxu1 }
 0x1cb   : > { %622 = vst [vmem:[#allocation2 + $0x60] sm:$0xff] %v590_v26  ;;  %654 = vst [vmem:[#allocation3 + $0xd0] sm:$0xff] %v590_v26  ;;  %v526_v32 = vadd.f32 %v525_v30, %v2937_v6  ;;  %v574_v33 = vadd.f32 %v573_v31, %v2937_v6  ;;  %v527_v34 = vpop.f32.mrb[15].mxu0  ;;  %v575_v35 = vpop.f32.mrb[15].mxu1 }
 0x1cc   : > { %638 = vst [vmem:[#allocation2 + $0xe0] sm:$0xff] %v606_v27  ;;  %670 = vst [vmem:[#allocation3 + $0x1d0] sm:$0xff] %v606_v27  ;;  %v528_v36 = vadd.f32 %v527_v34, %v2939_v8  ;;  %v576_v37 = vadd.f32 %v575_v35, %v2939_v8 }
 0x1cd   : > { %623 = vst [vmem:[#allocation2 + $0x68] sm:$0xff] %v591_v28  ;;  %655 = vst [vmem:[#allocation3 + $0xd8] sm:$0xff] %v591_v28  ;;  %v592_v38 = vmax.f32 %v526_v32, 0.0  ;;  %v608_v39 = vmax.f32 %v574_v33, 0.0 }
 0x1ce   : > { %639 = vst [vmem:[#allocation2 + $0xe8] sm:$0xff] %v607_v29  ;;  %671 = vst [vmem:[#allocation3 + $0x1d8] sm:$0xff] %v607_v29  ;;  %v593_v40 = vmax.f32 %v528_v36, 0.0  ;;  %v609_v41 = vmax.f32 %v576_v37, 0.0 }
 0x1cf   : > { %624 = vst [vmem:[#allocation2 + $0x70] sm:$0xff] %v592_v38  ;;  %656 = vst [vmem:[#allocation3 + $0xf0] sm:$0xff] %v592_v38 }
 0x1d0   : > { %640 = vst [vmem:[#allocation2 + $0xf0] sm:$0xff] %v608_v39  ;;  %672 = vst [vmem:[#allocation3 + $0x1f0] sm:$0xff] %v608_v39 }
 0x1d1   : > { %625 = vst [vmem:[#allocation2 + $0x78] sm:$0xff] %v593_v40  ;;  %657 = vst [vmem:[#allocation3 + $0xf8] sm:$0xff] %v593_v40 }
 0x1d2   : > { %641 = vst [vmem:[#allocation2 + $0xf8] sm:$0xff] %v609_v41  ;;  %673 = vst [vmem:[#allocation3 + $0x1f8] sm:$0xff] %v609_v41 }
 0x1d3 PF: > { %v675_v6 = vld [vmem:[#allocation2 + $0x8] sm:$0xff]  ;;  %v677_v42 = vld [vmem:[#allocation2 + $0x18] sm:$0xff]  ;;  %v674_v43 = vld [vmem:[#allocation2] sm:$0xff]  ;;  %v2603_v47 = vmov 0.0   ;;  %p1805_p12 = scmp.ne.s32.totalorder %s2663_s28, 7 }
 0x1d4   : > { %v1922_v44 = vpack.c.bf16 %v677_v42, %v675_v6  ;;  %v676_v45 = vld [vmem:[#allocation2 + $0x10] sm:$0xff]  ;;  %v679_v46 = vld [vmem:[#allocation2 + $0x28] sm:$0xff]  ;;  %v681_v8 = vld [vmem:[#allocation2 + $0x38] sm:$0xff]  ;;  %786 = vmatprep.mubr.f32.mxu0 %v2603_v47 }
 0x1d5   : > { %v1924_v48 = vpack.c.bf16 %v676_v45, %v674_v43  ;;  %v1926_v49 = vpack.c.bf16 %v681_v8, %v679_v46  ;;  %v678_v50 = vld [vmem:[#allocation2 + $0x20] sm:$0xff]  ;;  %v680_v51 = vld [vmem:[#allocation2 + $0x30] sm:$0xff]  ;;  %v683_v52 = vld [vmem:[#allocation2 + $0x48] sm:$0xff] }
 0x1d6   : > { %1923 = vmatprep.subr.bf16.mxu0 %v1922_v44  ;;  %v685_v53 = vld [vmem:[#allocation2 + $0x58] sm:$0xff]  ;;  %v1928_v54 = vpack.c.bf16 %v680_v51, %v678_v50  ;;  %v682_v56 = vld [vmem:[#allocation2 + $0x40] sm:$0xff]  ;;  %v684_v57 = vld [vmem:[#allocation2 + $0x50] sm:$0xff] }
 0x1d7   : > { %1925 = vmatpush1.bf16.msra.mxu0 %v1924_v48  ;;  %v1930_v55 = vpack.c.bf16 %v685_v53, %v683_v52  ;;  %v687_v58 = vld [vmem:[#allocation2 + $0x68] sm:$0xff]  ;;  %v1932_v60 = vpack.c.bf16 %v684_v57, %v682_v56  ;;  %v686_v62 = vld [vmem:[#allocation2 + $0x60] sm:$0xff]  ;;  %v688_v63 = vld [vmem:[#allocation2 + $0x70] sm:$0xff] }
 0x1d8   : > { %1927 = vmatprep.subr.bf16.mxu0 %v1926_v49  ;;  %v689_v59 = vld [vmem:[#allocation2 + $0x78] sm:$0xff]  ;;  %v691_v0 = vld [vmem:[#allocation2 + $0x88] sm:$0xff]  ;;  %v1936_v2 = vpack.c.bf16 %v688_v63, %v686_v62  ;;  %v690_v4 = vld [vmem:[#allocation2 + $0x80] sm:$0xff] }
 0x1d9   : > { %v1934_v61 = vpack.c.bf16 %v689_v59, %v687_v58  ;;  %v693_v1 = vld [vmem:[#allocation2 + $0x98] sm:$0xff]  ;;  %v692_v5 = vld [vmem:[#allocation2 + $0x90] sm:$0xff]  ;;  %v695_v7 = vld [vmem:[#allocation2 + $0xa8] sm:$0xff] }
 0x1da   : > { %v1938_v3 = vpack.c.bf16 %v693_v1, %v691_v0  ;;  %v697_v9 = vld [vmem:[#allocation2 + $0xb8] sm:$0xff]  ;;  %v694_v10 = vld [vmem:[#allocation2 + $0xa0] sm:$0xff]  ;;  %v1940_v11 = vpack.c.bf16 %v692_v5, %v690_v4  ;;  %v980_v12 = vld [vmem:[%s2857_s27 + $0x8] sm:$0xff] }
 0x1db   : > { %1929 = vmatpush1.bf16.msra.mxu0 %v1928_v54  ;;  %v982_v13 = vld [vmem:[%s2857_s27 + $0x18] sm:$0xff]  ;;  %v979_v14 = vld [vmem:[%s2857_s27] sm:$0xff]  ;;  %v1942_v15 = vpack.c.bf16 %v697_v9, %v695_v7  ;;  %v696_v16 = vld [vmem:[#allocation2 + $0xb0] sm:$0xff] }
 0x1dc   : > { %1931 = vmatprep.subr.bf16.mxu0 %v1930_v55  ;;  %v699_v17 = vld [vmem:[#allocation2 + $0xc8] sm:$0xff]  ;;  %v1954_v18 = vpack.c.bf16 %v982_v13, %v980_v12  ;;  %v981_v19 = vld [vmem:[%s2857_s27 + $0x10] sm:$0xff]  ;;  %v986_v23 = vld [vmem:[%s2857_s27 + $0x38] sm:$0xff]  ;;  %v1944_v27 = vpack.c.bf16 %v696_v16, %v694_v10 }
 0x1dd   : > { %v701_v20 = vld [vmem:[#allocation2 + $0xd8] sm:$0xff]  ;;  %v1956_v21 = vpack.c.bf16 %v981_v19, %v979_v14  ;;  %v984_v22 = vld [vmem:[%s2857_s27 + $0x28] sm:$0xff]  ;;  %v983_v25 = vld [vmem:[%s2857_s27 + $0x20] sm:$0xff] }
 0x1de   : > { %1955 = vmatprep.subr.bf16.mxu1 %v1954_v18  ;;  %v1958_v24 = vpack.c.bf16 %v986_v23, %v984_v22  ;;  %v985_v26 = vld [vmem:[%s2857_s27 + $0x30] sm:$0xff]  ;;  %v698_v28 = vld [vmem:[#allocation2 + $0xc0] sm:$0xff]  ;;  %v988_v30 = vld [vmem:[%s2857_s27 + $0x48] sm:$0xff]  ;;  %v1946_v31 = vpack.c.bf16 %v701_v20, %v699_v17 }
 0x1df   : > { %1933 = vmatpush1.bf16.msra.mxu0 %v1932_v60  ;;  %1957 = vmatpush1.bf16.msra.mxu1 %v1956_v21  ;;  %v1960_v29 = vpack.c.bf16 %v985_v26, %v983_v25  ;;  %v700_v32 = vld [vmem:[#allocation2 + $0xd0] sm:$0xff]  ;;  %v703_v33 = vld [vmem:[#allocation2 + $0xe8] sm:$0xff]  ;;  %v990_v34 = vld [vmem:[%s2857_s27 + $0x58] sm:$0xff] }
 0x1e0   : > { %1935 = vmatprep.subr.bf16.mxu0 %v1934_v61  ;;  %1959 = vmatprep.subr.bf16.mxu1 %v1958_v24  ;;  %v705_v35 = vld [vmem:[#allocation2 + $0xf8] sm:$0xff]  ;;  %v1962_v36 = vpack.c.bf16 %v990_v34, %v988_v30  ;;  %v987_v37 = vld [vmem:[%s2857_s27 + $0x40] sm:$0xff]  ;;  %v992_v39 = vld [vmem:[%s2857_s27 + $0x68] sm:$0xff]  ;;  %v1948_v41 = vpack.c.bf16 %v700_v32, %v698_v28 }
 0x1e1   : > { %v989_v38 = vld [vmem:[%s2857_s27 + $0x50] sm:$0xff]  ;;  %v994_v40 = vld [vmem:[%s2857_s27 + $0x78] sm:$0xff]  ;;  %v1950_v44 = vpack.c.bf16 %v705_v35, %v703_v33  ;;  %v1044_v45 = vld [vmem:[%s2857_s27 + $0x208] sm:$0xff] }
 0x1e2   : > { %v702_v6 = vld [vmem:[#allocation2 + $0xe0] sm:$0xff]  ;;  %v704_v42 = vld [vmem:[#allocation2 + $0xf0] sm:$0xff]  ;;  %v1964_v43 = vpack.c.bf16 %v989_v38, %v987_v37  ;;  %v1966_v46 = vpack.c.bf16 %v994_v40, %v992_v39 }
 0x1e3   : > { %1937 = vmatpush1.bf16.msra.mxu0 %v1936_v2  ;;  %1961 = vmatpush1.bf16.msra.mxu1 %v1960_v29  ;;  %v991_v8 = vld [vmem:[%s2857_s27 + $0x60] sm:$0xff]  ;;  %v993_v48 = vld [vmem:[%s2857_s27 + $0x70] sm:$0xff]  ;;  %v1046_v49 = vld [vmem:[%s2857_s27 + $0x218] sm:$0xff]  ;;  %v1952_v52 = vpack.c.bf16 %v704_v42, %v702_v6 }
 0x1e4   : > { %1939 = vmatprep.subr.bf16.mxu0 %v1938_v3  ;;  %1963 = vmatprep.subr.bf16.mxu1 %v1962_v36  ;;  %v996_v50 = vld [vmem:[%s2857_s27 + $0x88] sm:$0xff]  ;;  %v998_v51 = vld [vmem:[%s2857_s27 + $0x98] sm:$0xff]  ;;  %v1968_v53 = vpack.c.bf16 %v993_v48, %v991_v8  ;;  %v2994_v54 = vpack.c.bf16 %v1046_v49, %v1044_v45  ;;  %v1043_v55 = vld [vmem:[%s2857_s27 + $0x200] sm:$0xff] }
 0x1e5   : > { %v1045_v56 = vld [vmem:[%s2857_s27 + $0x210] sm:$0xff]  ;;  %v1048_v57 = vld [vmem:[%s2857_s27 + $0x228] sm:$0xff]  ;;  %v1970_v58 = vpack.c.bf16 %v998_v51, %v996_v50  ;;  %v1050_v59 = vld [vmem:[%s2857_s27 + $0x238] sm:$0xff] }
 0x1e6   : > { %v995_v60 = vld [vmem:[%s2857_s27 + $0x80] sm:$0xff]  ;;  %v997_v61 = vld [vmem:[%s2857_s27 + $0x90] sm:$0xff]  ;;  %v1000_v62 = vld [vmem:[%s2857_s27 + $0xa8] sm:$0xff]  ;;  %v3004_v1 = vpack.c.bf16 %v1045_v56, %v1043_v55  ;;  %v3007_v2 = vpack.c.bf16 %v1050_v59, %v1048_v57 }
 0x1e7   : > { %1941 = vmatpush1.bf16.msra.mxu0 %v1940_v11  ;;  %1965 = vmatpush1.bf16.msra.mxu1 %v1964_v43  ;;  %v1002_v63 = vld [vmem:[%s2857_s27 + $0xb8] sm:$0xff]  ;;  %v1047_v3 = vld [vmem:[%s2857_s27 + $0x220] sm:$0xff]  ;;  %v1049_v4 = vld [vmem:[%s2857_s27 + $0x230] sm:$0xff]  ;;  %v1972_v7 = vpack.c.bf16 %v997_v61, %v995_v60 }
 0x1e8   : > { %1943 = vmatprep.subr.bf16.mxu0 %v1942_v15  ;;  %1967 = vmatprep.subr.bf16.mxu1 %v1966_v46  ;;  %v706_v0 = vld [vmem:[#allocation4] sm:$0xff]  ;;  %v1052_v5 = vld [vmem:[%s2857_s27 + $0x248] sm:$0xff]  ;;  %v1974_v10 = vpack.c.bf16 %v1002_v63, %v1000_v62  ;;  %v1001_v12 = vld [vmem:[%s2857_s27 + $0xb0] sm:$0xff]  ;;  %v3019_v16 = vpack.c.bf16 %v1049_v4, %v1047_v3 }
 0x1e9   : > { %v1054_v9 = vld [vmem:[%s2857_s27 + $0x258] sm:$0xff]  ;;  %v999_v11 = vld [vmem:[%s2857_s27 + $0xa0] sm:$0xff]  ;;  %v1004_v13 = vld [vmem:[%s2857_s27 + $0xc8] sm:$0xff] }
 0x1ea   : > { %v1006_v14 = vld [vmem:[%s2857_s27 + $0xd8] sm:$0xff]  ;;  %v707_v15 = vld [vmem:[#allocation4 + $0x8] sm:$0xff]  ;;  %v3022_v17 = vpack.c.bf16 %v1054_v9, %v1052_v5  ;;  %v1053_v19 = vld [vmem:[%s2857_s27 + $0x250] sm:$0xff]  ;;  %v1976_v21 = vpack.c.bf16 %v1001_v12, %v999_v11 }
 0x1eb   : > { %1945 = vmatpush1.bf16.msra.mxu0 %v1944_v27  ;;  %1969 = vmatpush1.bf16.msra.mxu1 %v1968_v53  ;;  %v1051_v18 = vld [vmem:[%s2857_s27 + $0x240] sm:$0xff]  ;;  %v1056_v20 = vld [vmem:[%s2857_s27 + $0x268] sm:$0xff]  ;;  %v1058_v22 = vld [vmem:[%s2857_s27 + $0x278] sm:$0xff]  ;;  %v1978_v23 = vpack.c.bf16 %v1006_v14, %v1004_v13 }
 0x1ec   : > { %1947 = vmatprep.subr.bf16.mxu0 %v1946_v31  ;;  %1971 = vmatprep.subr.bf16.mxu1 %v1970_v58  ;;  %v1003_v24 = vld [vmem:[%s2857_s27 + $0xc0] sm:$0xff]  ;;  %v1005_v25 = vld [vmem:[%s2857_s27 + $0xd0] sm:$0xff]  ;;  %v1008_v26 = vld [vmem:[%s2857_s27 + $0xe8] sm:$0xff]  ;;  %v3034_v29 = vpack.c.bf16 %v1053_v19, %v1051_v18  ;;  %v3037_v30 = vpack.c.bf16 %v1058_v22, %v1056_v20 }
 0x1ed   : > { %v1010_v27 = vld [vmem:[%s2857_s27 + $0xf8] sm:$0xff]  ;;  %v708_v28 = vld [vmem:[#allocation4 + $0x10] sm:$0xff]  ;;  %v1055_v31 = vld [vmem:[%s2857_s27 + $0x260] sm:$0xff]  ;;  %v1980_v34 = vpack.c.bf16 %v1005_v25, %v1003_v24 }
 0x1ee   : > { %v1057_v32 = vld [vmem:[%s2857_s27 + $0x270] sm:$0xff]  ;;  %v1060_v33 = vld [vmem:[%s2857_s27 + $0x288] sm:$0xff]  ;;  %v1062_v35 = vld [vmem:[%s2857_s27 + $0x298] sm:$0xff]  ;;  %v1982_v36 = vpack.c.bf16 %v1010_v27, %v1008_v26 }
 0x1ef   : > { %1949 = vmatpush1.bf16.msra.mxu0 %v1948_v41  ;;  %1973 = vmatpush1.bf16.msra.mxu1 %v1972_v7  ;;  %v1007_v37 = vld [vmem:[%s2857_s27 + $0xe0] sm:$0xff]  ;;  %v1009_v38 = vld [vmem:[%s2857_s27 + $0xf0] sm:$0xff]  ;;  %v1012_v39 = vld [vmem:[%s2857_s27 + $0x108] sm:$0xff]  ;;  %v3049_v6 = vpack.c.bf16 %v1057_v32, %v1055_v31  ;;  %v3052_v42 = vpack.c.bf16 %v1062_v35, %v1060_v33 }
 0x1f0   : > { %1951 = vmatprep.subr.bf16.mxu0 %v1950_v44  ;;  %1975 = vmatprep.subr.bf16.mxu1 %v1974_v10  ;;  %v1014_v40 = vld [vmem:[%s2857_s27 + $0x118] sm:$0xff]  ;;  %v1059_v43 = vld [vmem:[%s2857_s27 + $0x280] sm:$0xff]  ;;  %v1061_v44 = vld [vmem:[%s2857_s27 + $0x290] sm:$0xff]  ;;  %v1984_v46 = vpack.c.bf16 %v1009_v38, %v1007_v37 }
 0x1f1   : > { %v709_v41 = vld [vmem:[#allocation4 + $0x18] sm:$0xff]  ;;  %v1064_v45 = vld [vmem:[%s2857_s27 + $0x2a8] sm:$0xff]  ;;  %v1986_v48 = vpack.c.bf16 %v1014_v40, %v1012_v39  ;;  %v1011_v49 = vld [vmem:[%s2857_s27 + $0x100] sm:$0xff]  ;;  %v3064_v55 = vpack.c.bf16 %v1061_v44, %v1059_v43 }
 0x1f2   : > { %v1066_v8 = vld [vmem:[%s2857_s27 + $0x2b8] sm:$0xff]  ;;  %v1013_v50 = vld [vmem:[%s2857_s27 + $0x110] sm:$0xff]  ;;  %v1016_v51 = vld [vmem:[%s2857_s27 + $0x128] sm:$0xff] }
 0x1f3   : > { %1953 = vmatpush1.bf16.msra.mxu0 %v1952_v52  ;;  %1977 = vmatpush1.bf16.msra.mxu1 %v1976_v21  ;;  %v1018_v52 = vld [vmem:[%s2857_s27 + $0x138] sm:$0xff]  ;;  %v3067_v56 = vpack.c.bf16 %v1066_v8, %v1064_v45  ;;  %v1063_v57 = vld [vmem:[%s2857_s27 + $0x2a0] sm:$0xff]  ;;  %v1065_v58 = vld [vmem:[%s2857_s27 + $0x2b0] sm:$0xff]  ;;  %v1988_v60 = vpack.c.bf16 %v1013_v50, %v1011_v49 }
 0x1f4   : > { %2019 = vmatprep.subr.bf16.mxu0 %v2994_v54  ;;  %1979 = vmatprep.subr.bf16.mxu1 %v1978_v23  ;;  %v710_v53 = vld [vmem:[#allocation4 + $0x20] sm:$0xff]  ;;  %v1068_v59 = vld [vmem:[%s2857_s27 + $0x2c8] sm:$0xff]  ;;  %v1990_v62 = vpack.c.bf16 %v1018_v52, %v1016_v51  ;;  %v3079_v7 = vpack.c.bf16 %v1065_v58, %v1063_v57  ;;  %v1069_v11 = vld [vmem:[%s2857_s27 + $0x2d0] sm:$0xff] }
 0x1f5   : > { %v1070_v61 = vld [vmem:[%s2857_s27 + $0x2d8] sm:$0xff]  ;;  %v1015_v63 = vld [vmem:[%s2857_s27 + $0x120] sm:$0xff]  ;;  %v1020_v3 = vld [vmem:[%s2857_s27 + $0x148] sm:$0xff] }
 0x1f6   : > { %787 = vmatmul.mubr.f32.vlgmr.msra.gmra.mrb[0].mxu0 %v706_v0  ;;  %v1017_v0 = vld [vmem:[%s2857_s27 + $0x130] sm:$0xff]  ;;  %v1022_v4 = vld [vmem:[%s2857_s27 + $0x158] sm:$0xff]  ;;  %v711_v5 = vld [vmem:[#allocation4 + $0x28] sm:$0xff]  ;;  %v3082_v9 = vpack.c.bf16 %v1070_v61, %v1068_v59 }
 0x1f7   : > { %792 = vmatprep.mubr.f32.mxu0 %v2603_v47  ;;  %2021 = vmatpush1.bf16.msra.mxu0 %v3004_v1  ;;  %v1067_v10 = vld [vmem:[%s2857_s27 + $0x2c0] sm:$0xff]  ;;  %v1072_v12 = vld [vmem:[%s2857_s27 + $0x2e8] sm:$0xff]  ;;  %v1992_v13 = vpack.c.bf16 %v1017_v0, %v1015_v63  ;;  %v1074_v14 = vld [vmem:[%s2857_s27 + $0x2f8] sm:$0xff] }
 0x1f8   : > { %2023 = vmatprep.subr.bf16.mxu0 %v3007_v2  ;;  %1981 = vmatpush1.bf16.msra.mxu1 %v1980_v34  ;;  %v1019_v18 = vld [vmem:[%s2857_s27 + $0x140] sm:$0xff]  ;;  %v1021_v19 = vld [vmem:[%s2857_s27 + $0x150] sm:$0xff]  ;;  %v1024_v20 = vld [vmem:[%s2857_s27 + $0x168] sm:$0xff]  ;;  %v3094_v23 = vpack.c.bf16 %v1069_v11, %v1067_v10  ;;  %v3097_v24 = vpack.c.bf16 %v1074_v14, %v1072_v12 }
 0x1f9   : > { %1983 = vmatprep.subr.bf16.mxu1 %v1982_v36  ;;  %v1026_v21 = vld [vmem:[%s2857_s27 + $0x178] sm:$0xff]  ;;  %v712_v22 = vld [vmem:[#allocation4 + $0x30] sm:$0xff]  ;;  %v1071_v25 = vld [vmem:[%s2857_s27 + $0x2e0] sm:$0xff] }
 0x1fa   : > { %793 = vmatmul.mubr.f32.gmra.mrb[2].mxu0 %v707_v15  ;;  %v1994_v15 = vpack.c.bf16 %v1022_v4, %v1020_v3  ;;  %v1073_v26 = vld [vmem:[%s2857_s27 + $0x2f0] sm:$0xff]  ;;  %v1076_v27 = vld [vmem:[%s2857_s27 + $0x308] sm:$0xff]  ;;  %v1078_v31 = vld [vmem:[%s2857_s27 + $0x318] sm:$0xff]  ;;  %v1998_v32 = vpack.c.bf16 %v1026_v21, %v1024_v20 }
 0x1fb   : > { %798 = vmatprep.mubr.f32.mxu0 %v2603_v47  ;;  %2025 = vmatpush1.bf16.msra.mxu0 %v3019_v16  ;;  %v1023_v33 = vld [vmem:[%s2857_s27 + $0x160] sm:$0xff]  ;;  %v1025_v34 = vld [vmem:[%s2857_s27 + $0x170] sm:$0xff]  ;;  %v1028_v35 = vld [vmem:[%s2857_s27 + $0x188] sm:$0xff]  ;;  %v3109_v38 = vpack.c.bf16 %v1073_v26, %v1071_v25  ;;  %v3112_v39 = vpack.c.bf16 %v1078_v31, %v1076_v27 }
 0x1fc   : > { %2027 = vmatprep.subr.bf16.mxu0 %v3022_v17  ;;  %1985 = vmatpush1.bf16.msra.mxu1 %v1984_v46  ;;  %v1030_v36 = vld [vmem:[%s2857_s27 + $0x198] sm:$0xff]  ;;  %v1075_v40 = vld [vmem:[%s2857_s27 + $0x300] sm:$0xff]  ;;  %v1080_v43 = vld [vmem:[%s2857_s27 + $0x328] sm:$0xff]  ;;  %v2000_v44 = vpack.c.bf16 %v1025_v34, %v1023_v33 }
 0x1fd   : > { %1987 = vmatprep.subr.bf16.mxu1 %v1986_v48  ;;  %v713_v37 = vld [vmem:[#allocation4 + $0x38] sm:$0xff]  ;;  %v2002_v46 = vpack.c.bf16 %v1030_v36, %v1028_v35  ;;  %v1027_v8 = vld [vmem:[%s2857_s27 + $0x180] sm:$0xff]  ;;  %v1032_v49 = vld [vmem:[%s2857_s27 + $0x1a8] sm:$0xff] }
 0x1fe   : > { %799 = vmatmul.mubr.f32.gmra.mrb[4].mxu0 %v708_v28  ;;  %v1996_v28 = vpack.c.bf16 %v1021_v19, %v1019_v18  ;;  %v1082_v45 = vld [vmem:[%s2857_s27 + $0x338] sm:$0xff]  ;;  %v1029_v48 = vld [vmem:[%s2857_s27 + $0x190] sm:$0xff]  ;;  %v1079_v57 = vld [vmem:[%s2857_s27 + $0x320] sm:$0xff] }
 0x1ff   : > { %804 = vmatprep.mubr.f32.mxu0 %v2603_v47  ;;  %2029 = vmatpush1.bf16.msra.mxu0 %v3034_v29  ;;  %v1034_v50 = vld [vmem:[%s2857_s27 + $0x1b8] sm:$0xff]  ;;  %v1081_v58 = vld [vmem:[%s2857_s27 + $0x330] sm:$0xff]  ;;  %v1084_v59 = vld [vmem:[%s2857_s27 + $0x348] sm:$0xff] }
 0x200   : > { %2031 = vmatprep.subr.bf16.mxu0 %v3037_v30  ;;  %1989 = vmatpush1.bf16.msra.mxu1 %v1988_v60  ;;  %v714_v51 = vld [vmem:[#allocation4 + $0x40] sm:$0xff]  ;;  %v2004_v60 = vpack.c.bf16 %v1029_v48, %v1027_v8  ;;  %v1033_v0 = vld [vmem:[%s2857_s27 + $0x1b0] sm:$0xff]  ;;  %v715_v3 = vld [vmem:[#allocation4 + $0x48] sm:$0xff]  ;;  %v3137_v4 = vpack.c.bf16 %v1081_v58, %v1079_v57 }
 0x201   : > { %1991 = vmatprep.subr.bf16.mxu1 %v1990_v62  ;;  %v1086_v61 = vld [vmem:[%s2857_s27 + $0x358] sm:$0xff]  ;;  %v2006_v62 = vpack.c.bf16 %v1034_v50, %v1032_v49  ;;  %v1031_v63 = vld [vmem:[%s2857_s27 + $0x1a0] sm:$0xff]  ;;  %v1085_v11 = vld [vmem:[%s2857_s27 + $0x350] sm:$0xff] }
 0x202   : > { %805 = vmatmul.mubr.f32.gmra.mrb[6].mxu0 %v709_v41  ;;  %v1077_v41 = vld [vmem:[%s2857_s27 + $0x310] sm:$0xff]  ;;  %v1083_v10 = vld [vmem:[%s2857_s27 + $0x340] sm:$0xff]  ;;  %v2008_v12 = vpack.c.bf16 %v1033_v0, %v1031_v63  ;;  %v1090_v14 = vld [vmem:[%s2857_s27 + $0x378] sm:$0xff] }
 0x203   : > { %810 = vmatprep.mubr.f32.mxu0 %v2603_v47  ;;  %2033 = vmatpush1.bf16.msra.mxu0 %v3049_v6  ;;  %v3124_v52 = vpack.c.bf16 %v1077_v41, %v1075_v40  ;;  %v3148_v18 = vpack.c.bf16 %v1085_v11, %v1083_v10  ;;  %v1087_v20 = vld [vmem:[%s2857_s27 + $0x360] sm:$0xff]  ;;  %v1089_v21 = vld [vmem:[%s2857_s27 + $0x370] sm:$0xff]  ;;  %v1094_v25 = vld [vmem:[%s2857_s27 + $0x398] sm:$0xff] }
 0x204   : > { %2035 = vmatprep.subr.bf16.mxu0 %v3052_v42  ;;  %1993 = vmatpush1.bf16.msra.mxu1 %v1992_v13  ;;  %v1088_v13 = vld [vmem:[%s2857_s27 + $0x368] sm:$0xff]  ;;  %v717_v26 = vld [vmem:[#allocation4 + $0x58] sm:$0xff]  ;;  %v3159_v27 = vpack.c.bf16 %v1089_v21, %v1087_v20  ;;  %v1091_v31 = vld [vmem:[%s2857_s27 + $0x380] sm:$0xff] }
 0x205   : > { %1995 = vmatprep.subr.bf16.mxu1 %v1994_v15  ;;  %v716_v15 = vld [vmem:[#allocation4 + $0x50] sm:$0xff]  ;;  %v3151_v19 = vpack.c.bf16 %v1090_v14, %v1088_v13  ;;  %v718_v33 = vld [vmem:[#allocation4 + $0x60] sm:$0xff]  ;;  %v719_v35 = vld [vmem:[#allocation4 + $0x68] sm:$0xff] }
 0x206   : > { %811 = vmatmul.mubr.f32.gmra.mrb[8].mxu0 %v710_v53  ;;  %v3127_v53 = vpack.c.bf16 %v1082_v45, %v1080_v43  ;;  %v720_v36 = vld [vmem:[#allocation4 + $0x70] sm:$0xff]  ;;  %v1098_v41 = vld [vmem:[%s2857_s27 + $0x3b8] sm:$0xff]  ;;  %v1035_v49 = vld [vmem:[%s2857_s27 + $0x1c0] sm:$0xff] }
 0x207   : > { %816 = vmatprep.mubr.f32.mxu0 %v2603_v47  ;;  %2037 = vmatpush1.bf16.msra.mxu0 %v3064_v55  ;;  %v1096_v40 = vld [vmem:[%s2857_s27 + $0x3a8] sm:$0xff]  ;;  %v1097_v45 = vld [vmem:[%s2857_s27 + $0x3b0] sm:$0xff]  ;;  %v1038_v8 = vld [vmem:[%s2857_s27 + $0x1d8] sm:$0xff] }
 0x208   : > { %2039 = vmatprep.subr.bf16.mxu0 %v3067_v56  ;;  %1997 = vmatpush1.bf16.msra.mxu1 %v1996_v28  ;;  %v3177_v43 = vpack.c.bf16 %v1098_v41, %v1096_v40  ;;  %v1037_v50 = vld [vmem:[%s2857_s27 + $0x1d0] sm:$0xff]  ;;  %v1100_v57 = vld [vmem:[%s2857_s27 + $0x3c8] sm:$0xff]  ;;  %v1102_v58 = vld [vmem:[%s2857_s27 + $0x3d8] sm:$0xff] }
 0x209   : > { %1999 = vmatprep.subr.bf16.mxu1 %v1998_v32  ;;  %v1093_v32 = vld [vmem:[%s2857_s27 + $0x390] sm:$0xff]  ;;  %v1042_v63 = vld [vmem:[%s2857_s27 + $0x1f8] sm:$0xff]  ;;  %v1039_v10 = vld [vmem:[%s2857_s27 + $0x1e0] sm:$0xff] }
 0x20a   : > { %817 = vmatmul.mubr.f32.gmra.mrb[10].mxu0 %v711_v5  ;;  %v3140_v5 = vpack.c.bf16 %v1086_v61, %v1084_v59  ;;  %v3168_v34 = vpack.c.bf16 %v1093_v32, %v1091_v31  ;;  %v3191_v59 = vpack.c.bf16 %v1102_v58, %v1100_v57  ;;  %v1101_v61 = vld [vmem:[%s2857_s27 + $0x3d0] sm:$0xff]  ;;  %v1104_v13 = vld [vmem:[%s2857_s27 + $0x3e8] sm:$0xff]  ;;  %v1106_v14 = vld [vmem:[%s2857_s27 + $0x3f8] sm:$0xff] }
 0x20b   : > { %822 = vmatprep.mubr.f32.mxu0 %v2603_v47  ;;  %2041 = vmatpush1.bf16.msra.mxu0 %v3079_v7  ;;  %v1041_v11 = vld [vmem:[%s2857_s27 + $0x1f0] sm:$0xff]  ;;  %v1103_v20 = vld [vmem:[%s2857_s27 + $0x3e0] sm:$0xff] }
 0x20c   : > { %2043 = vmatprep.subr.bf16.mxu0 %v3082_v9  ;;  %2001 = vmatpush1.bf16.msra.mxu1 %v2000_v44  ;;  %v1095_v44 = vld [vmem:[%s2857_s27 + $0x3a0] sm:$0xff]  ;;  %v1105_v21 = vld [vmem:[%s2857_s27 + $0x3f0] sm:$0xff] }
 0x20d   : > { %2003 = vmatprep.subr.bf16.mxu1 %v2002_v46  ;;  %v1036_v46 = vld [vmem:[%s2857_s27 + $0x1c8] sm:$0xff]  ;;  %v3183_v48 = vpack.c.bf16 %v1097_v45, %v1095_v44  ;;  %v922_v31 = vld [vmem:[#allocation3 + $0x38] sm:$0xff] }
 0x20e   : > { %823 = vmatmul.mubr.f32.gmra.mrb[12].mxu0 %v712_v22  ;;  %v1092_v22 = vld [vmem:[%s2857_s27 + $0x388] sm:$0xff]  ;;  %v934_v40 = vld [vmem:[#allocation3 + $0x98] sm:$0xff] }
 0x20f   : > { %828 = vmatprep.mubr.f32.mxu0 %v2603_v47  ;;  %2045 = vmatpush1.bf16.msra.mxu0 %v3094_v23  ;;  %v3162_v28 = vpack.c.bf16 %v1094_v25, %v1092_v22  ;;  %v3209_v22 = vpack.c.bf16 %v1105_v21, %v1103_v20  ;;  %v918_v25 = vld [vmem:[#allocation3 + $0x18] sm:$0xff]  ;;  %v921_v32 = vld [vmem:[#allocation3 + $0x30] sm:$0xff] }
 0x210   : > { %2047 = vmatprep.subr.bf16.mxu0 %v3097_v24  ;;  %2005 = vmatpush1.bf16.msra.mxu1 %v2004_v60  ;;  %v1099_v60 = vld [vmem:[%s2857_s27 + $0x3c0] sm:$0xff]  ;;  %v938_v41 = vld [vmem:[#allocation3 + $0xb8] sm:$0xff]  ;;  %v937_v44 = vld [vmem:[#allocation3 + $0xb0] sm:$0xff] }
 0x211   : > { %2007 = vmatprep.subr.bf16.mxu1 %v2006_v62  ;;  %v1040_v62 = vld [vmem:[%s2857_s27 + $0x1e8] sm:$0xff]  ;;  %v3197_v0 = vpack.c.bf16 %v1101_v61, %v1099_v60  ;;  %v942_v45 = vld [vmem:[#allocation3 + $0xd8] sm:$0xff] }
 0x212   : > { %829 = vmatmul.mubr.f32.gmra.mrb[14].mxu0 %v713_v37  ;;  %v721_v37 = vld [vmem:[#allocation4 + $0x78] sm:$0xff]  ;;  %v953_v57 = vld [vmem:[#allocation3 + $0x130] sm:$0xff] }
 0x213   : > { %834 = vmatprep.mubr.f32.mxu0 %v2603_v47  ;;  %2049 = vmatpush1.bf16.msra.mxu0 %v3109_v38  ;;  %v958_v58 = vld [vmem:[#allocation3 + $0x158] sm:$0xff]  ;;  %v957_v60 = vld [vmem:[#allocation3 + $0x150] sm:$0xff] }
 0x214   : > { %2051 = vmatprep.subr.bf16.mxu0 %v3112_v39  ;;  %2009 = vmatpush1.bf16.msra.mxu1 %v2008_v12  ;;  %v2016_v12 = vpack.c.bf16 %v1041_v11, %v1039_v10  ;;  %v962_v61 = vld [vmem:[#allocation3 + $0x178] sm:$0xff] }
 0x215   : > { %v970_v21 = vld [vmem:[#allocation3 + $0x1b8] sm:$0xff] }
 0x216   : > { %835 = vmatmul.mubr.f32.gmra.mrb[16].mxu0 %v714_v51  ;;  %v2012_v51 = vpack.c.bf16 %v1037_v50, %v1035_v49  ;;  %v950_v49 = vld [vmem:[#allocation3 + $0x118] sm:$0xff]  ;;  %v949_v50 = vld [vmem:[#allocation3 + $0x110] sm:$0xff] }
 0x217   : > { %840 = vmatprep.mubr.f32.mxu0 %v2603_v47  ;;  %2053 = vmatpush1.bf16.msra.mxu0 %v3124_v52 }
 0x218   : > { %2055 = vmatprep.subr.bf16.mxu0 %v3127_v53 }
 0x21a   : > { %841 = vmatmul.mubr.f32.gmra.mrb[18].mxu0 %v715_v3  ;;  %v2014_v3 = vpack.c.bf16 %v1042_v63, %v1040_v62  ;;  %v961_v62 = vld [vmem:[#allocation3 + $0x170] sm:$0xff] }
 0x21b   : > { %846 = vmatprep.mubr.f32.mxu0 %v2603_v47  ;;  %2057 = vmatpush1.bf16.msra.mxu0 %v3137_v4 }
 0x21c   : > { %2059 = vmatprep.subr.bf16.mxu0 %v3140_v5 }
 0x21e   : > { %847 = vmatmul.mubr.f32.gmra.mrb[20].mxu0 %v716_v15  ;;  %v3205_v15 = vpack.c.bf16 %v1106_v14, %v1104_v13 }
 0x21f   : > { %852 = vmatprep.mubr.f32.mxu0 %v2603_v47  ;;  %2061 = vmatpush1.bf16.msra.mxu0 %v3148_v18 }
 0x220   : > { %2063 = vmatprep.subr.bf16.mxu0 %v3151_v19 }
 0x222   : > { %853 = vmatmul.mubr.f32.gmra.mrb[22].mxu0 %v717_v26  ;;  %v917_v26 = vld [vmem:[#allocation3 + $0x10] sm:$0xff] }
 0x223   : > { %858 = vmatprep.mubr.f32.mxu0 %v2603_v47  ;;  %2065 = vmatpush1.bf16.msra.mxu0 %v3159_v27 }
 0x224   : > { %2067 = vmatprep.subr.bf16.mxu0 %v3162_v28 }
 0x226   : > { %859 = vmatmul.mubr.f32.gmra.mrb[24].mxu0 %v718_v33  ;;  %v926_v33 = vld [vmem:[#allocation3 + $0x58] sm:$0xff] }
 0x227   : > { %864 = vmatprep.mubr.f32.mxu0 %v2603_v47  ;;  %2069 = vmatpush1.bf16.msra.mxu0 %v3168_v34 }
 0x228   : > { %2071 = vmatprep.subr.bf16.mxu0 %v3177_v43 }
 0x22a   : > { %865 = vmatmul.mubr.f32.gmra.mrb[26].mxu0 %v719_v35  ;;  %v925_v35 = vld [vmem:[#allocation3 + $0x50] sm:$0xff] }
 0x22b   : > { %870 = vmatprep.mubr.f32.mxu0 %v2603_v47  ;;  %2073 = vmatpush1.bf16.msra.mxu0 %v3183_v48 }
 0x22c   : > { %2075 = vmatprep.subr.bf16.mxu0 %v3191_v59 }
 0x22e   : > { %871 = vmatmul.mubr.f32.gmra.mrb[28].mxu0 %v720_v36  ;;  %v930_v36 = vld [vmem:[#allocation3 + $0x78] sm:$0xff] }
 0x22f   : > { %876 = vmatprep.mubr.f32.mxu0 %v2603_v47  ;;  %v2010_v47 = vpack.c.bf16 %v1038_v8, %v1036_v46  ;;  %2077 = vmatpush1.bf16.msra.mxu0 %v3197_v0  ;;  %v941_v46 = vld [vmem:[#allocation3 + $0xd0] sm:$0xff]  ;;  %v946_v8 = vld [vmem:[#allocation3 + $0xf8] sm:$0xff] }
 0x230   : > { %2079 = vmatprep.subr.bf16.mxu0 %v3205_v15 }
 0x231   : > { %2011 = vmatprep.subr.bf16.mxu1 %v2010_v47  ;;  %v945_v47 = vld [vmem:[#allocation3 + $0xf0] sm:$0xff] }
 0x232   : > { %877 = vmatmul.mubr.f32.gmra.mrb[30].mxu0 %v721_v37  ;;  %2013 = vmatpush1.bf16.msra.mxu1 %v2012_v51  ;;  %v929_v37 = vld [vmem:[#allocation3 + $0x70] sm:$0xff]  ;;  %v954_v51 = vld [vmem:[#allocation3 + $0x138] sm:$0xff] }
 0x233   : > { %2015 = vmatprep.subr.bf16.mxu1 %v2014_v3  ;;  %2081 = vmatpush1.bf16.msra.mxu0 %v3209_v22 }
 0x234   : > { %1332 = vmatprep.mubr.f32.mxu0 %v918_v25  ;;  %v973_v25 = vld [vmem:[#allocation3 + $0x1d0] sm:$0xff] }
 0x236   : > { %2017 = vmatpush1.bf16.msra.mxu1 %v2016_v12  ;;  %1333 = vmatmul.mubr.f32.vlgmr.msra.gmra.mrb[32].mxu0 %v917_v26  ;;  %v978_v26 = vld [vmem:[#allocation3 + $0x1f8] sm:$0xff] }
 0x237   : > { %2130 = vmatprep.subr.bf16.mxu1 %v2994_v54  ;;  %1338 = vmatprep.mubr.f32.mxu0 %v922_v31  ;;  %v933_v54 = vld [vmem:[#allocation3 + $0x90] sm:$0xff] }
 0x23a   : > { %1339 = vmatmul.mubr.f32.gmra.mrb[34].mxu0 %v921_v32 }
 0x23b   : > { %1344 = vmatprep.mubr.f32.mxu0 %v926_v33 }
 0x23e   : > { %1345 = vmatmul.mubr.f32.gmra.mrb[36].mxu0 %v925_v35 }
 0x23f   : > { %1350 = vmatprep.mubr.f32.mxu0 %v930_v36 }
 0x242   : > { %1351 = vmatmul.mubr.f32.gmra.mrb[38].mxu0 %v929_v37 }
 0x243   : > { %1356 = vmatprep.mubr.f32.mxu0 %v934_v40 }
 0x246   : > { %1357 = vmatmul.mubr.f32.gmra.mrb[40].mxu0 %v933_v54 }
 0x247   : > { %1362 = vmatprep.mubr.f32.mxu0 %v938_v41 }
 0x24a   : > { %1363 = vmatmul.mubr.f32.gmra.mrb[42].mxu0 %v937_v44 }
 0x24b   : > { %1368 = vmatprep.mubr.f32.mxu0 %v942_v45 }
 0x24e   : > { %1369 = vmatmul.mubr.f32.gmra.mrb[44].mxu0 %v941_v46 }
 0x24f   : > { %1374 = vmatprep.mubr.f32.mxu0 %v946_v8 }
 0x252   : > { %1375 = vmatmul.mubr.f32.gmra.mrb[46].mxu0 %v945_v47 }
 0x253   : > { %1380 = vmatprep.mubr.f32.mxu0 %v950_v49 }
 0x256   : > { %1381 = vmatmul.mubr.f32.gmra.mrb[48].mxu0 %v949_v50 }
 0x257   : > { %1386 = vmatprep.mubr.f32.mxu0 %v954_v51 }
 0x25a   : > { %1387 = vmatmul.mubr.f32.gmra.mrb[50].mxu0 %v953_v57 }
 0x25b   : > { %1392 = vmatprep.mubr.f32.mxu0 %v958_v58 }
 0x25e   : > { %1393 = vmatmul.mubr.f32.gmra.mrb[52].mxu0 %v957_v60 }
 0x25f   : > { %1398 = vmatprep.mubr.f32.mxu0 %v962_v61 }
 0x262   : > { %1399 = vmatmul.mubr.f32.gmra.mrb[54].mxu0 %v961_v62 }
 0x2c9   : > { %v788_v63 = vpop.f32.mrb[0].mxu0 }
 0x2ca   : > { %v790_v3 = vpop.f32.mrb[1].mxu0 }
 0x2cb   : > { %1171 = vmatprep.mubr.f32.mxu1 %v790_v3  ;;  %v2338_v3 = vld [vmem:[#allocation2] sm:$0xff] }
 0x2cc   : > { %1172 = vmatmul.mubr.f32.vlgmr.msra.gmra.mrb[0].mxu1 %v788_v63 }
 0x2cd   : > { %v794_v10 = vpop.f32.mrb[2].mxu0  ;;  %2146 = vmatpush1.bf16.msra.mxu1 %v3004_v1 }
 0x2ce   : > { %v796_v11 = vpop.f32.mrb[3].mxu0  ;;  %2131 = vmatprep.subr.bf16.mxu1 %v3007_v2 }
 0x2cf   : > { %1177 = vmatprep.mubr.f32.mxu1 %v796_v11 }
 0x2d0   : > { %1178 = vmatmul.mubr.f32.gmra.mrb[2].mxu1 %v794_v10 }
 0x2d1   : > { %v800_v12 = vpop.f32.mrb[4].mxu0  ;;  %2147 = vmatpush1.bf16.msra.mxu1 %v3019_v16 }
 0x2d2   : > { %v802_v13 = vpop.f32.mrb[5].mxu0  ;;  %2132 = vmatprep.subr.bf16.mxu1 %v3022_v17 }
 0x2d3   : > { %1183 = vmatprep.mubr.f32.mxu1 %v802_v13 }
 0x2d4   : > { %1184 = vmatmul.mubr.f32.gmra.mrb[4].mxu1 %v800_v12  ;;  %v2339_v12 = vld [vmem:[#allocation2 + $0x8] sm:$0xff] }
 0x2d5   : > { %v806_v14 = vpop.f32.mrb[6].mxu0  ;;  %2148 = vmatpush1.bf16.msra.mxu1 %v3034_v29 }
 0x2d6   : > { %v808_v20 = vpop.f32.mrb[7].mxu0  ;;  %2133 = vmatprep.subr.bf16.mxu1 %v3037_v30 }
 0x2d7   : > { %1189 = vmatprep.mubr.f32.mxu1 %v808_v20 }
 0x2d8   : > { %1190 = vmatmul.mubr.f32.gmra.mrb[6].mxu1 %v806_v14 }
 0x2d9   : > { %v812_v1 = vpop.f32.mrb[8].mxu0  ;;  %2149 = vmatpush1.bf16.msra.mxu1 %v3049_v6 }
 0x2da   : > { %v814_v2 = vpop.f32.mrb[9].mxu0  ;;  %2134 = vmatprep.subr.bf16.mxu1 %v3052_v42 }
 0x2db   : > { %1195 = vmatprep.mubr.f32.mxu1 %v814_v2 }
 0x2dc   : > { %1196 = vmatmul.mubr.f32.gmra.mrb[8].mxu1 %v812_v1 }
 0x2dd   : > { %v818_v16 = vpop.f32.mrb[10].mxu0  ;;  %2150 = vmatpush1.bf16.msra.mxu1 %v3064_v55 }
 0x2de   : > { %v820_v17 = vpop.f32.mrb[11].mxu0  ;;  %2135 = vmatprep.subr.bf16.mxu1 %v3067_v56 }
 0x2df   : > { %1201 = vmatprep.mubr.f32.mxu1 %v820_v17 }
 0x2e0   : > { %1202 = vmatmul.mubr.f32.gmra.mrb[10].mxu1 %v818_v16  ;;  %v2340_v16 = vld [vmem:[#allocation2 + $0x10] sm:$0xff] }
 0x2e1   : > { %v824_v29 = vpop.f32.mrb[12].mxu0  ;;  %2151 = vmatpush1.bf16.msra.mxu1 %v3079_v7 }
 0x2e2   : > { %v826_v30 = vpop.f32.mrb[13].mxu0  ;;  %2136 = vmatprep.subr.bf16.mxu1 %v3082_v9 }
 0x2e3   : > { %1207 = vmatprep.mubr.f32.mxu1 %v826_v30 }
 0x2e4   : > { %1208 = vmatmul.mubr.f32.gmra.mrb[12].mxu1 %v824_v29 }
 0x2e5   : > { %v830_v6 = vpop.f32.mrb[14].mxu0  ;;  %2152 = vmatpush1.bf16.msra.mxu1 %v3094_v23 }
 0x2e6   : > { %v832_v42 = vpop.f32.mrb[15].mxu0  ;;  %2137 = vmatprep.subr.bf16.mxu1 %v3097_v24 }
 0x2e7   : > { %1213 = vmatprep.mubr.f32.mxu1 %v832_v42 }
 0x2e8   : > { %1214 = vmatmul.mubr.f32.gmra.mrb[14].mxu1 %v830_v6  ;;  %v2341_v6 = vld [vmem:[#allocation2 + $0x18] sm:$0xff] }
 0x2e9   : > { %v836_v55 = vpop.f32.mrb[16].mxu0  ;;  %2153 = vmatpush1.bf16.msra.mxu1 %v3109_v38 }
 0x2ea   : > { %v838_v56 = vpop.f32.mrb[17].mxu0  ;;  %2138 = vmatprep.subr.bf16.mxu1 %v3112_v39 }
 0x2eb   : > { %1219 = vmatprep.mubr.f32.mxu1 %v838_v56 }
 0x2ec   : > { %1220 = vmatmul.mubr.f32.gmra.mrb[16].mxu1 %v836_v55 }
 0x2ed   : > { %v842_v7 = vpop.f32.mrb[18].mxu0  ;;  %2154 = vmatpush1.bf16.msra.mxu1 %v3124_v52 }
 0x2ee   : > { %v844_v9 = vpop.f32.mrb[19].mxu0  ;;  %2139 = vmatprep.subr.bf16.mxu1 %v3127_v53 }
 0x2ef   : > { %1225 = vmatprep.mubr.f32.mxu1 %v844_v9 }
 0x2f0   : > { %1226 = vmatmul.mubr.f32.gmra.mrb[18].mxu1 %v842_v7 }
 0x2f1   : > { %v848_v23 = vpop.f32.mrb[20].mxu0  ;;  %2155 = vmatpush1.bf16.msra.mxu1 %v3137_v4 }
 0x2f2   : > { %v850_v24 = vpop.f32.mrb[21].mxu0  ;;  %2140 = vmatprep.subr.bf16.mxu1 %v3140_v5 }
 0x2f3   : > { %1231 = vmatprep.mubr.f32.mxu1 %v850_v24 }
 0x2f4   : > { %1232 = vmatmul.mubr.f32.gmra.mrb[20].mxu1 %v848_v23  ;;  %v2342_v23 = vld [vmem:[#allocation2 + $0x20] sm:$0xff] }
 0x2f5   : > { %v854_v38 = vpop.f32.mrb[22].mxu0  ;;  %2156 = vmatpush1.bf16.msra.mxu1 %v3148_v18 }
 0x2f6   : > { %v856_v39 = vpop.f32.mrb[23].mxu0  ;;  %2141 = vmatprep.subr.bf16.mxu1 %v3151_v19 }
 0x2f7   : > { %1237 = vmatprep.mubr.f32.mxu1 %v856_v39 }
 0x2f8   : > { %1238 = vmatmul.mubr.f32.gmra.mrb[22].mxu1 %v854_v38 }
 0x2f9   : > { %v860_v52 = vpop.f32.mrb[24].mxu0  ;;  %2157 = vmatpush1.bf16.msra.mxu1 %v3159_v27 }
 0x2fa   : > { %v862_v53 = vpop.f32.mrb[25].mxu0  ;;  %2142 = vmatprep.subr.bf16.mxu1 %v3162_v28 }
 0x2fb   : > { %1243 = vmatprep.mubr.f32.mxu1 %v862_v53 }
 0x2fc   : > { %1244 = vmatmul.mubr.f32.gmra.mrb[24].mxu1 %v860_v52  ;;  %v2343_v52 = vld [vmem:[#allocation2 + $0x28] sm:$0xff] }
 0x2fd   : > { %v866_v4 = vpop.f32.mrb[26].mxu0  ;;  %2158 = vmatpush1.bf16.msra.mxu1 %v3168_v34  ;;  %v966_v34 = vld [vmem:[#allocation3 + $0x198] sm:$0xff] }
 0x2fe   : > { %v868_v5 = vpop.f32.mrb[27].mxu0  ;;  %2143 = vmatprep.subr.bf16.mxu1 %v3177_v43  ;;  %v965_v43 = vld [vmem:[#allocation3 + $0x190] sm:$0xff] }
 0x2ff   : > { %1249 = vmatprep.mubr.f32.mxu1 %v868_v5 }
 0x300   : > { %1250 = vmatmul.mubr.f32.gmra.mrb[26].mxu1 %v866_v4 }
 0x301   : > { %v872_v18 = vpop.f32.mrb[28].mxu0  ;;  %2159 = vmatpush1.bf16.msra.mxu1 %v3183_v48  ;;  %v969_v48 = vld [vmem:[#allocation3 + $0x1b0] sm:$0xff] }
 0x302   : > { %v874_v19 = vpop.f32.mrb[29].mxu0  ;;  %2144 = vmatprep.subr.bf16.mxu1 %v3191_v59  ;;  %v974_v59 = vld [vmem:[#allocation3 + $0x1d8] sm:$0xff] }
 0x303   : > { %1255 = vmatprep.mubr.f32.mxu1 %v874_v19 }
 0x304   : > { %1256 = vmatmul.mubr.f32.gmra.mrb[28].mxu1 %v872_v18 }
 0x305   : > { %v878_v27 = vpop.f32.mrb[30].mxu0  ;;  %2160 = vmatpush1.bf16.msra.mxu1 %v3197_v0  ;;  %v977_v0 = vld [vmem:[#allocation3 + $0x1f0] sm:$0xff] }
 0x306   : > { %v880_v28 = vpop.f32.mrb[31].mxu0  ;;  %2145 = vmatprep.subr.bf16.mxu1 %v3205_v15 }
 0x307   : > { %1261 = vmatprep.mubr.f32.mxu1 %v880_v28 }
 0x308   : > { %1262 = vmatmul.mubr.f32.gmra.mrb[30].mxu1 %v878_v27  ;;  %v2344_v27 = vld [vmem:[#allocation2 + $0x30] sm:$0xff] }
 0x309   : > { %2161 = vmatpush1.bf16.msra.mxu1 %v3209_v22  ;;  %1404 = vmatprep.mubr.f32.mxu1 %v966_v34  ;;  %v1334_v15 = vpop.f32.mrb[32].mxu0 }
 0x30a   : > { %v1336_v31 = vpop.f32.mrb[33].mxu0 }
 0x30c   : > { %1405 = vmatmul.mubr.f32.vlgmr.msra.gmra.mrb[24].mxu1 %v965_v43 }
 0x30d   : > { %1410 = vmatprep.mubr.f32.mxu1 %v970_v21  ;;  %v1340_v32 = vpop.f32.mrb[34].mxu0  ;;  %v2345_v21 = vld [vmem:[#allocation2 + $0x38] sm:$0xff] }
 0x30e   : > { %v1342_v33 = vpop.f32.mrb[35].mxu0 }
 0x310   : > { %1411 = vmatmul.mubr.f32.gmra.mrb[26].mxu1 %v969_v48 }
 0x311   : > { %1416 = vmatprep.mubr.f32.mxu1 %v974_v59  ;;  %v1346_v22 = vpop.f32.mrb[36].mxu0 }
 0x312   : > { %v1348_v35 = vpop.f32.mrb[37].mxu0 }
 0x314   : > { %1417 = vmatmul.mubr.f32.gmra.mrb[28].mxu1 %v973_v25 }
 0x315   : > { %1422 = vmatprep.mubr.f32.mxu1 %v978_v26  ;;  %v1352_v36 = vpop.f32.mrb[38].mxu0 }
 0x316   : > { %v1354_v37 = vpop.f32.mrb[39].mxu0 }
 0x318   : > { %1423 = vmatmul.mubr.f32.gmra.mrb[30].mxu1 %v977_v0 }
 0x319   : > { %v3245_v40 = vpop.f32.mrb[40].mxu0 }
 0x31a   : > { %v3247_v54 = vpop.f32.mrb[41].mxu0 }
 0x31d   : > { %v3249_v41 = vpop.f32.mrb[42].mxu0 }
 0x31e   : > { %v3251_v44 = vpop.f32.mrb[43].mxu0 }
 0x321   : > { %v3253_v45 = vpop.f32.mrb[44].mxu0 }
 0x322   : > { %v3255_v46 = vpop.f32.mrb[45].mxu0 }
 0x325   : > { %v3257_v8 = vpop.f32.mrb[46].mxu0 }
 0x326   : > { %v3259_v47 = vpop.f32.mrb[47].mxu0 }
 0x329   : > { %v3261_v49 = vpop.f32.mrb[48].mxu0 }
 0x32a   : > { %v3263_v50 = vpop.f32.mrb[49].mxu0 }
 0x32d   : > { %v3265_v51 = vpop.f32.mrb[50].mxu0 }
 0x32e   : > { %v3267_v57 = vpop.f32.mrb[51].mxu0 }
 0x331   : > { %v3269_v58 = vpop.f32.mrb[52].mxu0 }
 0x332   : > { %v3271_v60 = vpop.f32.mrb[53].mxu0 }
 0x335   : > { %v3273_v61 = vpop.f32.mrb[54].mxu0 }
 0x336   : > { %v3275_v62 = vpop.f32.mrb[55].mxu0 }
 0x39f   : > { %v1173_v63 = vpop.f32.mrb[0].mxu1 }
 0x3a0   : > { %v1174_v10 = vadd.f32 %v2338_v3, %v1173_v63  ;;  %v1175_v11 = vpop.f32.mrb[1].mxu1 }
 0x3a1   : > { %v1176_v13 = vadd.f32 %v2339_v12, %v1175_v11 }
 0x3a2   : > { %v3277_v14 = vadd.f32 %v1334_v15, %v1174_v10  ;;  %v2346_v15 = vld [vmem:[#allocation2 + $0x40] sm:$0xff]  ;;  %v2348_v10 = vld [vmem:[#allocation2 + $0x50] sm:$0xff] }
 0x3a3   : > { %v3279_v20 = vadd.f32 %v1336_v31, %v1176_v13  ;;  %v1179_v1 = vpop.f32.mrb[2].mxu1 }
 0x3a4   : > { %v1429_v2 = vmax.f32 %v3277_v14, 0.0  ;;  %v1180_v17 = vadd.f32 %v2340_v16, %v1179_v1  ;;  %v1181_v29 = vpop.f32.mrb[3].mxu1  ;;  %v2349_v1 = vld [vmem:[#allocation2 + $0x58] sm:$0xff] }
 0x3a5   : > { %v1430_v30 = vmax.f32 %v3279_v20, 0.0  ;;  %v1182_v42 = vadd.f32 %v2341_v6, %v1181_v29  ;;  %v2350_v6 = vld [vmem:[#allocation2 + $0x60] sm:$0xff] }
 0x3a6   : > { %1461 = vst [vmem:[#allocation2] sm:$0xff] %v1429_v2  ;;  %v3285_v55 = vadd.f32 %v1340_v32, %v1180_v17 }
 0x3a7   : > { %1462 = vst [vmem:[#allocation2 + $0x8] sm:$0xff] %v1430_v30  ;;  %v3289_v56 = vadd.f32 %v1342_v33, %v1182_v42  ;;  %v1185_v7 = vpop.f32.mrb[4].mxu1  ;;  %1600 = vmatprep.mubr.f32.mxu0 (!%p1805_p12), %v1430_v30  ;;  %v1501_v30 = vld [vmem:[#allocation11 + $0x20] sm:$0xff] (!%p1805_p12) }
 0x3a8   : > { %v1431_v9 = vmax.f32 %v3285_v55, 0.0  ;;  %v1186_v24 = vadd.f32 %v2342_v23, %v1185_v7  ;;  %v1187_v38 = vpop.f32.mrb[5].mxu1 }
 0x3a9   : > { %v1432_v39 = vmax.f32 %v3289_v56, 0.0  ;;  %v1188_v53 = vadd.f32 %v2343_v52, %v1187_v38 }
 0x3aa   : > { %1463 = vst [vmem:[#allocation2 + $0x10] sm:$0xff] %v1431_v9  ;;  %v3295_v4 = vadd.f32 %v1346_v22, %v1186_v24  ;;  %v2347_v22 = vld [vmem:[#allocation2 + $0x48] sm:$0xff] }
 0x3ab   : > { %1464 = vst [vmem:[#allocation2 + $0x18] sm:$0xff] %v1432_v39  ;;  %v3299_v5 = vadd.f32 %v1348_v35, %v1188_v53  ;;  %v1191_v18 = vpop.f32.mrb[6].mxu1  ;;  %v2351_v24 = vld [vmem:[#allocation2 + $0x68] sm:$0xff] }
 0x3ac   : > { %v1433_v19 = vmax.f32 %v3295_v4, 0.0  ;;  %v1192_v28 = vadd.f32 %v2344_v27, %v1191_v18  ;;  %v1193_v34 = vpop.f32.mrb[7].mxu1  ;;  %v2352_v18 = vld [vmem:[#allocation2 + $0x70] sm:$0xff] }
 0x3ad   : > { %v1434_v43 = vmax.f32 %v3299_v5, 0.0  ;;  %v1194_v48 = vadd.f32 %v2345_v21, %v1193_v34  ;;  %v2353_v21 = vld [vmem:[#allocation2 + $0x78] sm:$0xff] }
 0x3ae   : > { %1465 = vst [vmem:[#allocation2 + $0x20] sm:$0xff] %v1433_v19  ;;  %v3305_v59 = vadd.f32 %v1352_v36, %v1192_v28 }
 0x3af   : > { %1466 = vst [vmem:[#allocation2 + $0x28] sm:$0xff] %v1434_v43  ;;  %v3309_v25 = vadd.f32 %v1354_v37, %v1194_v48  ;;  %v1197_v26 = vpop.f32.mrb[8].mxu1 }
 0x3b0   : > { %v1435_v0 = vmax.f32 %v3305_v59, 0.0  ;;  %v1198_v31 = vadd.f32 %v2346_v15, %v1197_v26  ;;  %v1199_v32 = vpop.f32.mrb[9].mxu1 }
 0x3b1   : > { %v1436_v33 = vmax.f32 %v3309_v25, 0.0  ;;  %v1200_v35 = vadd.f32 %v2347_v22, %v1199_v32 }
 0x3b2   : > { %1467 = vst [vmem:[#allocation2 + $0x30] sm:$0xff] %v1435_v0  ;;  %v3316_v36 = vadd.f32 %v3245_v40, %v1198_v31  ;;  %v2354_v31 = vld [vmem:[#allocation2 + $0x80] sm:$0xff] }
 0x3b3   : > { %1468 = vst [vmem:[#allocation2 + $0x38] sm:$0xff] %v1436_v33  ;;  %v3321_v37 = vadd.f32 %v3247_v54, %v1200_v35  ;;  %v1203_v63 = vpop.f32.mrb[10].mxu1 }
 0x3b4   : > { %v3623_v3 = vmax.f32 %v3316_v36, 0.0  ;;  %v1204_v11 = vadd.f32 %v2348_v10, %v1203_v63  ;;  %v1205_v12 = vpop.f32.mrb[11].mxu1  ;;  %v2355_v63 = vld [vmem:[#allocation2 + $0x88] sm:$0xff]  ;;  %v3642_v14 = vmax.f32 (!%p1805_p12), %v3316_v36, 0.0 }
 0x3b5   : > { %v1438_v13 = vmax.f32 %v3321_v37, 0.0  ;;  %v1206_v16 = vadd.f32 %v2349_v1, %v1205_v12  ;;  %v2356_v1 = vld [vmem:[#allocation2 + $0x90] sm:$0xff] }
 0x3b6   : > { %1469 = vst [vmem:[#allocation2 + $0x40] sm:$0xff] %v3623_v3  ;;  %v3328_v40 = vadd.f32 %v3249_v41, %v1204_v11 }
 0x3b7   : > { %1470 = vst [vmem:[#allocation2 + $0x48] sm:$0xff] %v1438_v13  ;;  %v3333_v54 = vadd.f32 %v3251_v44, %v1206_v16  ;;  %v1209_v17 = vpop.f32.mrb[12].mxu1 }
 0x3b8   : > { %v3618_v29 = vmax.f32 %v3328_v40, 0.0  ;;  %v1210_v42 = vadd.f32 %v2350_v6, %v1209_v17  ;;  %v1211_v7 = vpop.f32.mrb[13].mxu1 }
 0x3b9   : > { %v3621_v23 = vmax.f32 %v3333_v54, 0.0  ;;  %v1212_v38 = vadd.f32 %v2351_v24, %v1211_v7  ;;  %v3644_v55 = vmax.f32 (!%p1805_p12), %v3333_v54, 0.0 }
 0x3ba   : > { %1471 = vst [vmem:[#allocation2 + $0x50] sm:$0xff] %v3618_v29  ;;  %v3340_v41 = vadd.f32 %v3253_v45, %v1210_v42  ;;  %v2357_v42 = vld [vmem:[#allocation2 + $0x98] sm:$0xff] }
 0x3bb   : > { %1472 = vst [vmem:[#allocation2 + $0x58] sm:$0xff] %v3621_v23  ;;  %v3345_v44 = vadd.f32 %v3255_v46, %v1212_v38  ;;  %v1215_v52 = vpop.f32.mrb[14].mxu1  ;;  %v1517_v23 = vld [vmem:[#allocation11 + $0xa0] sm:$0xff] (!%p1805_p12) }
 0x3bc   : > { %v3612_v53 = vmax.f32 %v3340_v41, 0.0  ;;  %v1216_v27 = vadd.f32 %v2352_v18, %v1215_v52  ;;  %v1217_v28 = vpop.f32.mrb[15].mxu1  ;;  %v2358_v52 = vld [vmem:[#allocation2 + $0xa0] sm:$0xff] }
 0x3bd   : > { %v3613_v34 = vmax.f32 %v3345_v44, 0.0  ;;  %v1218_v48 = vadd.f32 %v2353_v21, %v1217_v28  ;;  %v2359_v21 = vld [vmem:[#allocation2 + $0xa8] sm:$0xff]  ;;  %v3648_v4 = vmax.f32 (!%p1805_p12), %v3345_v44, 0.0 }
 0x3be   : > { %1473 = vst [vmem:[#allocation2 + $0x60] sm:$0xff] %v3612_v53  ;;  %v3352_v45 = vadd.f32 %v3257_v8, %v1216_v27 }
 0x3bf   : > { %1474 = vst [vmem:[#allocation2 + $0x68] sm:$0xff] %v3613_v34  ;;  %v3357_v46 = vadd.f32 %v3259_v47, %v1218_v48  ;;  %v1221_v26 = vpop.f32.mrb[16].mxu1 }
 0x3c0   : > { %v3610_v15 = vmax.f32 %v3352_v45, 0.0  ;;  %v1222_v32 = vadd.f32 %v2354_v31, %v1221_v26  ;;  %v1223_v22 = vpop.f32.mrb[17].mxu1 }
 0x3c1   : > { %v3611_v35 = vmax.f32 %v3357_v46, 0.0  ;;  %v1224_v10 = vadd.f32 %v2355_v63, %v1223_v22  ;;  %v3652_v59 = vmax.f32 (!%p1805_p12), %v3357_v46, 0.0 }
 0x3c2   : > { %1475 = vst [vmem:[#allocation2 + $0x70] sm:$0xff] %v3610_v15  ;;  %v3364_v8 = vadd.f32 %v3261_v49, %v1222_v32  ;;  %v2360_v32 = vld [vmem:[#allocation2 + $0xb0] sm:$0xff] }
 0x3c3   : > { %1476 = vst [vmem:[#allocation2 + $0x78] sm:$0xff] %v3611_v35  ;;  %v3369_v47 = vadd.f32 %v3263_v50, %v1224_v10  ;;  %v1227_v11 = vpop.f32.mrb[18].mxu1  ;;  %v2368_v35 = vld [vmem:[#allocation2 + $0xf0] sm:$0xff] }
 0x3c4   : > { %v1445_v12 = vmax.f32 %v3364_v8, 0.0  ;;  %v1228_v16 = vadd.f32 %v2356_v1, %v1227_v11  ;;  %v1229_v17 = vpop.f32.mrb[19].mxu1  ;;  %v2361_v11 = vld [vmem:[#allocation2 + $0xb8] sm:$0xff] }
 0x3c5   : > { %v1446_v6 = vmax.f32 %v3369_v47, 0.0  ;;  %v1230_v7 = vadd.f32 %v2357_v42, %v1229_v17  ;;  %v1502_v47 = vld [vmem:[#allocation11 + $0x28] sm:$0xff] (!%p1805_p12) }
 0x3c6   : > { %1477 = vst [vmem:[#allocation2 + $0x80] sm:$0xff] %v1445_v12  ;;  %v3376_v49 = vadd.f32 %v3265_v51, %v1228_v16 }
 0x3c7   : > { %1478 = vst [vmem:[#allocation2 + $0x88] sm:$0xff] %v1446_v6  ;;  %v3381_v50 = vadd.f32 %v3267_v57, %v1230_v7  ;;  %v1233_v24 = vpop.f32.mrb[20].mxu1  ;;  %v2362_v7 = vld [vmem:[#allocation2 + $0xc0] sm:$0xff]  ;;  %1640 = vmatprep.mubr.f32.mxu1 (!%p1805_p12), %v1446_v6  ;;  %v1519_v6 = vld [vmem:[#allocation11 + $0xb0] sm:$0xff] (!%p1805_p12) }
 0x3c8   : > { %v1447_v38 = vmax.f32 %v3376_v49, 0.0  ;;  %v1234_v18 = vadd.f32 %v2358_v52, %v1233_v24  ;;  %v1235_v27 = vpop.f32.mrb[21].mxu1  ;;  %v2363_v52 = vld [vmem:[#allocation2 + $0xc8] sm:$0xff] }
 0x3c9   : > { %v1448_v28 = vmax.f32 %v3381_v50, 0.0  ;;  %v1236_v48 = vadd.f32 %v2359_v21, %v1235_v27 }
 0x3ca   : > { %1479 = vst [vmem:[#allocation2 + $0x90] sm:$0xff] %v1447_v38  ;;  %v3388_v51 = vadd.f32 %v3269_v58, %v1234_v18 }
 0x3cb   : > { %1480 = vst [vmem:[#allocation2 + $0x98] sm:$0xff] %v1448_v28  ;;  %v3393_v57 = vadd.f32 %v3271_v60, %v1236_v48  ;;  %v1239_v26 = vpop.f32.mrb[22].mxu1  ;;  %v2364_v48 = vld [vmem:[#allocation2 + $0xd0] sm:$0xff] }
 0x3cc   : > { %v1449_v31 = vmax.f32 %v3388_v51, 0.0  ;;  %v1240_v22 = vadd.f32 %v2360_v32, %v1239_v26  ;;  %v1241_v63 = vpop.f32.mrb[23].mxu1 }
 0x3cd   : > { %v1450_v10 = vmax.f32 %v3393_v57, 0.0  ;;  %v1242_v1 = vadd.f32 %v2361_v11, %v1241_v63 }
 0x3ce   : > { %1481 = vst [vmem:[#allocation2 + $0xa0] sm:$0xff] %v1449_v31  ;;  %v3400_v58 = vadd.f32 %v3273_v61, %v1240_v22  ;;  %v2365_v22 = vld [vmem:[#allocation2 + $0xd8] sm:$0xff] }
 0x3cf   : > { %1482 = vst [vmem:[#allocation2 + $0xa8] sm:$0xff] %v1450_v10  ;;  %v3405_v60 = vadd.f32 %v3275_v62, %v1242_v1 }
 0x3d0   : > { %v1451_v16 = vmax.f32 %v3400_v58, 0.0 }
 0x3d1   : > { %v1452_v17 = vmax.f32 %v3405_v60, 0.0 }
 0x3d2   : > { %1483 = vst [vmem:[#allocation2 + $0xb0] sm:$0xff] %v1451_v16 }
 0x3d3   : > { %1484 = vst [vmem:[#allocation2 + $0xb8] sm:$0xff] %v1452_v17 }
 0x3df   : > { %v1406_v42 = vpop.f32.mrb[24].mxu1 }
 0x3e0   : > { %v3413_v61 = vadd.f32 %v2362_v7, %v1406_v42  ;;  %v1408_v24 = vpop.f32.mrb[25].mxu1  ;;  %v2366_v7 = vld [vmem:[#allocation2 + $0xe0] sm:$0xff] }
 0x3e1   : > { %v3415_v18 = vadd.f32 %v2363_v52, %v1408_v24 }
 0x3e2   : > { %v3622_v62 = vmax.f32 %v3413_v61, 0.0 }
 0x3e3   : > { %v1454_v27 = vmax.f32 %v3415_v18, 0.0  ;;  %v1412_v21 = vpop.f32.mrb[26].mxu1 }
 0x3e4   : > { %1485 = vst [vmem:[#allocation2 + $0xc0] sm:$0xff] %v3622_v62  ;;  %v3421_v26 = vadd.f32 %v2364_v48, %v1412_v21  ;;  %v1414_v32 = vpop.f32.mrb[27].mxu1  ;;  %v2367_v21 = vld [vmem:[#allocation2 + $0xe8] sm:$0xff] }
 0x3e5   : > { %1486 = vst [vmem:[#allocation2 + $0xc8] sm:$0xff] %v1454_v27  ;;  %v3425_v63 = vadd.f32 %v2365_v22, %v1414_v32  ;;  %v1518_v62 = vld [vmem:[#allocation11 + $0xa8] sm:$0xff] (!%p1805_p12) }
 0x3e6   : > { %v3616_v11 = vmax.f32 %v3421_v26, 0.0  ;;  %v2090_v20 = vpack.c.bf16 (!%p1805_p12), %v1518_v62, %v1517_v23  ;;  %v1505_v23 = vld [vmem:[#allocation11 + $0x40] sm:$0xff] (!%p1805_p12)  ;;  %v1506_v62 = vld [vmem:[#allocation11 + $0x48] sm:$0xff] (!%p1805_p12) }
 0x3e7   : > { %v3619_v1 = vmax.f32 %v3425_v63, 0.0  ;;  %v1418_v42 = vpop.f32.mrb[28].mxu1  ;;  %v3645_v56 = vmax.f32 (!%p1805_p12), %v3425_v63, 0.0 }
 0x3e8   : > { %1487 = vst [vmem:[#allocation2 + $0xd0] sm:$0xff] %v3616_v11  ;;  %v3431_v24 = vadd.f32 %v2366_v7, %v1418_v42  ;;  %v1420_v52 = vpop.f32.mrb[29].mxu1  ;;  %v2369_v7 = vld [vmem:[#allocation2 + $0xf8] sm:$0xff] }
 0x3e9   : > { %1488 = vst [vmem:[#allocation2 + $0xd8] sm:$0xff] %v3619_v1  ;;  %v3435_v48 = vadd.f32 %v2367_v21, %v1420_v52  ;;  %v1516_v11 = vld [vmem:[#allocation11 + $0x98] sm:$0xff] (!%p1805_p12)  ;;  %v1499_v1 = vld [vmem:[#allocation11 + $0x10] sm:$0xff] (!%p1805_p12) }
 0x3ea   : > { %v3614_v32 = vmax.f32 %v3431_v24, 0.0 }
 0x3eb   : > { %v3615_v22 = vmax.f32 %v3435_v48, 0.0  ;;  %v1424_v15 = vpop.f32.mrb[30].mxu1  ;;  %1496 = sbr.rel (%p1805_p12) target bundleno = 1287 (0x507), region = 80  ;;  %v3649_v5 = vmax.f32 (!%p1805_p12), %v3435_v48, 0.0 }
 0x3ec   : > { %1489 = vst [vmem:[#allocation2 + $0xe0] sm:$0xff] %v3614_v32  ;;  %v3441_v53 = vadd.f32 %v2368_v35, %v1424_v15  ;;  %v1426_v42 = vpop.f32.mrb[31].mxu1  ;;  %v1513_v15 = vld [vmem:[#allocation11 + $0x80] sm:$0xff] (!%p1805_p12)  ;;  %v1514_v35 = vld [vmem:[#allocation11 + $0x88] sm:$0xff] (!%p1805_p12) }
 0x3ed   : > { %1490 = vst [vmem:[#allocation2 + $0xe8] sm:$0xff] %v3615_v22  ;;  %v3445_v34 = vadd.f32 %v2369_v7, %v1426_v42  ;;  %v1497_v32 = vld [vmem:[#allocation11] sm:$0xff] (!%p1805_p12)  ;;  %v2082_v42 = vpack.c.bf16 (!%p1805_p12), %v1514_v35, %v1513_v15  ;;  %v1498_v7 = vld [vmem:[#allocation11 + $0x8] sm:$0xff] (!%p1805_p12)  ;;  %v1515_v22 = vld [vmem:[#allocation11 + $0x90] sm:$0xff] (!%p1805_p12) }
 0x3ee   : > { %v3617_v52 = vmax.f32 %v3441_v53, 0.0  ;;  %v2086_v29 = vpack.c.bf16 (!%p1805_p12), %v1516_v11, %v1515_v22  ;;  %v1520_v15 = vld [vmem:[#allocation11 + $0xb8] sm:$0xff] (!%p1805_p12)  ;;  %v1503_v22 = vld [vmem:[#allocation11 + $0x30] sm:$0xff] (!%p1805_p12) }
 0x3ef   : > { %v3620_v21 = vmax.f32 %v3445_v34, 0.0  ;;  %2083 = vmatprep.subr.bf16.mxu0 (!%p1805_p12), %v2082_v42  ;;  %2226 = vmatprep.subr.bf16.mxu1 (!%p1805_p12), %v2082_v42  ;;  %v2094_v11 = vpack.c.bf16 (!%p1805_p12), %v1520_v15, %v1519_v6  ;;  %v1504_v35 = vld [vmem:[#allocation11 + $0x38] sm:$0xff] (!%p1805_p12)  ;;  %v1521_v42 = vld [vmem:[#allocation11 + $0xc0] sm:$0xff] (!%p1805_p12)  ;;  %v1526_v15 = vld [vmem:[#allocation11 + $0xe8] sm:$0xff] (!%p1805_p12)  ;;  %v3653_v25 = vmax.f32 (!%p1805_p12), %v3445_v34, 0.0 }
 0x3f0   : > { %1491 = vst [vmem:[#allocation2 + $0xf0] sm:$0xff] %v3617_v52  ;;  %v2084_v52 = vpack.c.bf16 (!%p1805_p12), %v1498_v7, %v1497_v32  ;;  %v2092_v32 = vpack.c.bf16 (!%p1805_p12), %v1502_v47, %v1501_v30  ;;  %v1522_v7 = vld [vmem:[#allocation11 + $0xc8] sm:$0xff] (!%p1805_p12)  ;;  %v1507_v30 = vld [vmem:[#allocation11 + $0x50] sm:$0xff] (!%p1805_p12)  ;;  %v1508_v47 = vld [vmem:[#allocation11 + $0x58] sm:$0xff] (!%p1805_p12) }
 0x3f1   : > { %1492 = vst [vmem:[#allocation2 + $0xf8] sm:$0xff] %v3620_v21  ;;  %v1500_v21 = vld [vmem:[#allocation11 + $0x18] sm:$0xff] (!%p1805_p12)  ;;  %v1525_v6 = vld [vmem:[#allocation11 + $0xe0] sm:$0xff] (!%p1805_p12) }
 0x3f2   : > { %2085 = vmatpush3.bf16.msra.mxu0 %v2084_v52  ;;  %2234 = vmatpush3.bf16.msra.mxu1 %v2084_v52  ;;  %v2088_v3 = vpack.c.bf16 %v1500_v21, %v1499_v1  ;;  %v2096_v1 = vpack.c.bf16 %v1504_v35, %v1503_v22  ;;  %v1523_v52 = vld [vmem:[#allocation11 + $0xd0] sm:$0xff]  ;;  %v1524_v21 = vld [vmem:[#allocation11 + $0xd8] sm:$0xff]  ;;  %v1509_v22 = vld [vmem:[#allocation11 + $0x60] sm:$0xff] }
 0x3f3   : > { %2087 = vmatprep.subr.bf16.mxu0 %v2086_v29  ;;  %2227 = vmatprep.subr.bf16.mxu1 %v2086_v29  ;;  %v2098_v29 = vpack.c.bf16 %v1522_v7, %v1521_v42  ;;  %v1510_v35 = vld [vmem:[#allocation11 + $0x68] sm:$0xff]  ;;  %v1527_v42 = vld [vmem:[#allocation11 + $0xf0] sm:$0xff]  ;;  %v1528_v7 = vld [vmem:[#allocation11 + $0xf8] sm:$0xff] }
 0x3f6   : > { %2089 = vmatpush3.bf16.msra.mxu0 %v2088_v3  ;;  %2235 = vmatpush3.bf16.msra.mxu1 %v2088_v3  ;;  %v2100_v3 = vpack.c.bf16 %v1506_v62, %v1505_v23  ;;  %v1511_v23 = vld [vmem:[#allocation11 + $0x70] sm:$0xff]  ;;  %v1512_v62 = vld [vmem:[#allocation11 + $0x78] sm:$0xff] }
 0x3f7   : > { %2091 = vmatprep.subr.bf16.mxu0 %v2090_v20  ;;  %2228 = vmatprep.subr.bf16.mxu1 %v2090_v20  ;;  %v2102_v20 = vpack.c.bf16 %v1524_v21, %v1523_v52  ;;  %v2112_v52 = vpack.c.bf16 %v1512_v62, %v1511_v23 }
 0x3fa   : > { %2093 = vmatpush3.bf16.msra.mxu0 %v2092_v32  ;;  %2236 = vmatpush3.bf16.msra.mxu1 %v2092_v32  ;;  %v2104_v32 = vpack.c.bf16 %v1508_v47, %v1507_v30 }
 0x3fb   : > { %2095 = vmatprep.subr.bf16.mxu0 %v2094_v11  ;;  %2229 = vmatprep.subr.bf16.mxu1 %v2094_v11  ;;  %v2106_v11 = vpack.c.bf16 %v1526_v15, %v1525_v6 }
 0x3fe   : > { %2097 = vmatpush3.bf16.msra.mxu0 %v2096_v1  ;;  %2237 = vmatpush3.bf16.msra.mxu1 %v2096_v1  ;;  %v2108_v1 = vpack.c.bf16 %v1510_v35, %v1509_v22 }
 0x3ff   : > { %2099 = vmatprep.subr.bf16.mxu0 %v2098_v29  ;;  %2230 = vmatprep.subr.bf16.mxu1 %v2098_v29  ;;  %v2110_v29 = vpack.c.bf16 %v1528_v7, %v1527_v42 }
 0x402   : > { %2101 = vmatpush3.bf16.msra.mxu0 %v2100_v3  ;;  %2238 = vmatpush3.bf16.msra.mxu1 %v2100_v3 }
 0x403   : > { %2103 = vmatprep.subr.bf16.mxu0 %v2102_v20  ;;  %2231 = vmatprep.subr.bf16.mxu1 %v2102_v20 }
 0x406   : > { %2105 = vmatpush3.bf16.msra.mxu0 %v2104_v32  ;;  %2239 = vmatpush3.bf16.msra.mxu1 %v2104_v32 }
 0x407   : > { %2107 = vmatprep.subr.bf16.mxu0 %v2106_v11  ;;  %2232 = vmatprep.subr.bf16.mxu1 %v2106_v11 }
 0x40a   : > { %2109 = vmatpush3.bf16.msra.mxu0 %v2108_v1  ;;  %2240 = vmatpush3.bf16.msra.mxu1 %v2108_v1 }
 0x40b   : > { %2111 = vmatprep.subr.bf16.mxu0 %v2110_v29  ;;  %2233 = vmatprep.subr.bf16.mxu1 %v2110_v29 }
 0x40e   : > { %2113 = vmatpush3.bf16.msra.mxu0 %v2112_v52  ;;  %2241 = vmatpush3.bf16.msra.mxu1 %v2112_v52 }
 0x411   : > { %1601 = vmatmul.mubr.f32.vlgmr.msra.gmra.mrb[0].mxu0 %v1429_v2  ;;  %1641 = vmatmul.mubr.f32.vlgmr.msra.gmra.mrb[0].mxu1 %v1445_v12  ;;  %v3643_v2 = vmax.f32 %v3413_v61, 0.0 }
 0x412   : > { %1605 = vmatprep.mubr.f32.mxu0 %v1432_v39  ;;  %1645 = vmatprep.mubr.f32.mxu1 %v1448_v28  ;;  %v3647_v39 = vmax.f32 %v3421_v26, 0.0 }
 0x415   : > { %1606 = vmatmul.mubr.f32.gmra.mrb[2].mxu0 %v1431_v9  ;;  %1646 = vmatmul.mubr.f32.gmra.mrb[2].mxu1 %v1447_v38  ;;  %v3646_v9 = vmax.f32 %v3328_v40, 0.0 }
 0x416   : > { %1610 = vmatprep.mubr.f32.mxu0 %v1434_v43  ;;  %1650 = vmatprep.mubr.f32.mxu1 %v1450_v10  ;;  %v3651_v43 = vmax.f32 %v3431_v24, 0.0 }
 0x419   : > { %1611 = vmatmul.mubr.f32.gmra.mrb[4].mxu0 %v1433_v19  ;;  %1651 = vmatmul.mubr.f32.gmra.mrb[4].mxu1 %v1449_v31  ;;  %v3650_v19 = vmax.f32 %v3340_v41, 0.0 }
 0x41a   : > { %1615 = vmatprep.mubr.f32.mxu0 %v1436_v33  ;;  %1655 = vmatprep.mubr.f32.mxu1 %v1452_v17  ;;  %v3655_v33 = vmax.f32 %v3441_v53, 0.0 }
 0x41d   : > { %1616 = vmatmul.mubr.f32.gmra.mrb[6].mxu0 %v1435_v0  ;;  %1656 = vmatmul.mubr.f32.gmra.mrb[6].mxu1 %v1451_v16  ;;  %v3654_v0 = vmax.f32 %v3352_v45, 0.0 }
 0x41e   : > { %1620 = vmatprep.mubr.f32.mxu0 %v1438_v13  ;;  %1660 = vmatprep.mubr.f32.mxu1 %v1454_v27  ;;  %v3518_v13 = vld [vmem:[#allocation12] ss:$0 sm:$0xff] }
 0x421   : > { %1621 = vmatmul.mubr.f32.gmra.mrb[8].mxu0 %v3642_v14  ;;  %1661 = vmatmul.mubr.f32.gmra.mrb[8].mxu1 %v3643_v2 }
 0x422   : > { %1625 = vmatprep.mubr.f32.mxu0 %v3644_v55  ;;  %1665 = vmatprep.mubr.f32.mxu1 %v3645_v56 }
 0x425   : > { %1626 = vmatmul.mubr.f32.gmra.mrb[10].mxu0 %v3646_v9  ;;  %1666 = vmatmul.mubr.f32.gmra.mrb[10].mxu1 %v3647_v39 }
 0x426   : > { %1630 = vmatprep.mubr.f32.mxu0 %v3648_v4  ;;  %1670 = vmatprep.mubr.f32.mxu1 %v3649_v5 }
 0x429   : > { %1631 = vmatmul.mubr.f32.gmra.mrb[12].mxu0 %v3650_v19  ;;  %1671 = vmatmul.mubr.f32.gmra.mrb[12].mxu1 %v3651_v43 }
 0x42a   : > { %1635 = vmatprep.mubr.f32.mxu0 %v3652_v59  ;;  %1675 = vmatprep.mubr.f32.mxu1 %v3653_v25 }
 0x42d   : > { %1636 = vmatmul.mubr.f32.gmra.mrb[14].mxu0 %v3654_v0  ;;  %1676 = vmatmul.mubr.f32.gmra.mrb[14].mxu1 %v3655_v33 }
 0x4e4   : > { %v1842_v36 = vpop.f32.mrb[0].mxu0  ;;  %v1866_v37 = vpop.f32.mrb[0].mxu1 }
 0x4e5   : > { %v1843_v40 = vpop.f32.mrb[1].mxu0  ;;  %v1867_v54 = vpop.f32.mrb[1].mxu1 }
 0x4e6   : > { %v1844_v41 = vadd.f32 %v1843_v40, %v1842_v36  ;;  %v1868_v44 = vadd.f32 %v1867_v54, %v1866_v37 }
 0x4e8   : > { %v1603_v46 = vadd.f32 %v1844_v41, %v3518_v13  ;;  %v1643_v8 = vadd.f32 %v1868_v44, %v3518_v13  ;;  %v1845_v34 = vpop.f32.mrb[2].mxu0  ;;  %v1869_v12 = vpop.f32.mrb[2].mxu1 }
 0x4e9   : > { %v1846_v49 = vpop.f32.mrb[3].mxu0  ;;  %v1870_v45 = vpop.f32.mrb[3].mxu1 }
 0x4ea   : > { %1681 = vst [vmem:[%s3604_s7] sm:$0xff] %v1603_v46  ;;  %1689 = vst [vmem:[%s3604_s7 + $0x40] sm:$0xff] %v1643_v8  ;;  %v1847_v53 = vadd.f32 %v1846_v49, %v1845_v34  ;;  %v1871_v50 = vadd.f32 %v1870_v45, %v1869_v12 }
 0x4ec   : > { %v1608_v38 = vadd.f32 %v1847_v53, %v3518_v13  ;;  %v1648_v28 = vadd.f32 %v1871_v50, %v3518_v13  ;;  %v1848_v51 = vpop.f32.mrb[4].mxu0  ;;  %v1872_v57 = vpop.f32.mrb[4].mxu1 }
 0x4ed   : > { %v1849_v31 = vpop.f32.mrb[5].mxu0  ;;  %v1873_v10 = vpop.f32.mrb[5].mxu1 }
 0x4ee   : > { %1682 = vst [vmem:[%s3604_s7 + $0x8] sm:$0xff] %v1608_v38  ;;  %1690 = vst [vmem:[%s3604_s7 + $0x48] sm:$0xff] %v1648_v28  ;;  %v1850_v58 = vadd.f32 %v1849_v31, %v1848_v51  ;;  %v1874_v60 = vadd.f32 %v1873_v10, %v1872_v57 }
 0x4f0   : > { %v1613_v16 = vadd.f32 %v1850_v58, %v3518_v13  ;;  %v1653_v17 = vadd.f32 %v1874_v60, %v3518_v13  ;;  %v1851_v61 = vpop.f32.mrb[6].mxu0  ;;  %v1875_v18 = vpop.f32.mrb[6].mxu1 }
 0x4f1   : > { %v1852_v27 = vpop.f32.mrb[7].mxu0  ;;  %v1876_v26 = vpop.f32.mrb[7].mxu1 }
 0x4f2   : > { %1683 = vst [vmem:[%s3604_s7 + $0x10] sm:$0xff] %v1613_v16  ;;  %1691 = vst [vmem:[%s3604_s7 + $0x50] sm:$0xff] %v1653_v17  ;;  %v1853_v63 = vadd.f32 %v1852_v27, %v1851_v61  ;;  %v1877_v24 = vadd.f32 %v1876_v26, %v1875_v18 }
 0x4f4   : > { %v1618_v48 = vadd.f32 %v1853_v63, %v3518_v13  ;;  %v1658_v21 = vadd.f32 %v1877_v24, %v3518_v13  ;;  %v1854_v3 = vpop.f32.mrb[8].mxu0  ;;  %v1878_v20 = vpop.f32.mrb[8].mxu1 }
 0x4f5   : > { %v1855_v30 = vpop.f32.mrb[9].mxu0  ;;  %v1879_v47 = vpop.f32.mrb[9].mxu1 }
 0x4f6   : > { %1684 = vst [vmem:[%s3604_s7 + $0x18] sm:$0xff] %v1618_v48  ;;  %1692 = vst [vmem:[%s3604_s7 + $0x58] sm:$0xff] %v1658_v21  ;;  %v1856_v6 = vadd.f32 %v1855_v30, %v1854_v3  ;;  %v1880_v15 = vadd.f32 %v1879_v47, %v1878_v20 }
 0x4f8   : > { %v1623_v32 = vadd.f32 %v1856_v6, %v3518_v13  ;;  %v1663_v11 = vadd.f32 %v1880_v15, %v3518_v13  ;;  %v1857_v22 = vpop.f32.mrb[10].mxu0  ;;  %v1881_v35 = vpop.f32.mrb[10].mxu1 }
 0x4f9   : > { %v1858_v42 = vpop.f32.mrb[11].mxu0  ;;  %v1882_v7 = vpop.f32.mrb[11].mxu1 }
 0x4fa   : > { %1685 = vst [vmem:[%s3604_s7 + $0x20] sm:$0xff] %v1623_v32  ;;  %1693 = vst [vmem:[%s3604_s7 + $0x60] sm:$0xff] %v1663_v11  ;;  %v1859_v1 = vadd.f32 %v1858_v42, %v1857_v22  ;;  %v1883_v29 = vadd.f32 %v1882_v7, %v1881_v35 }
 0x4fc   : > { %v1628_v23 = vadd.f32 %v1859_v1, %v3518_v13  ;;  %v1668_v62 = vadd.f32 %v1883_v29, %v3518_v13  ;;  %v1860_v52 = vpop.f32.mrb[12].mxu0  ;;  %v1884_v14 = vpop.f32.mrb[12].mxu1 }
 0x4fd   : > { %v1861_v2 = vpop.f32.mrb[13].mxu0  ;;  %v1885_v55 = vpop.f32.mrb[13].mxu1 }
 0x4fe   : > { %1686 = vst [vmem:[%s3604_s7 + $0x28] sm:$0xff] %v1628_v23  ;;  %1694 = vst [vmem:[%s3604_s7 + $0x68] sm:$0xff] %v1668_v62  ;;  %v1862_v56 = vadd.f32 %v1861_v2, %v1860_v52  ;;  %v1886_v9 = vadd.f32 %v1885_v55, %v1884_v14 }
 0x500   : > { %v1633_v39 = vadd.f32 %v1862_v56, %v3518_v13  ;;  %v1673_v4 = vadd.f32 %v1886_v9, %v3518_v13  ;;  %v1863_v5 = vpop.f32.mrb[14].mxu0  ;;  %v1887_v19 = vpop.f32.mrb[14].mxu1 }
 0x501   : > { %v1864_v43 = vpop.f32.mrb[15].mxu0  ;;  %v1888_v59 = vpop.f32.mrb[15].mxu1 }
 0x502   : > { %1687 = vst [vmem:[%s3604_s7 + $0x30] sm:$0xff] %v1633_v39  ;;  %1695 = vst [vmem:[%s3604_s7 + $0x70] sm:$0xff] %v1673_v4  ;;  %v1865_v25 = vadd.f32 %v1864_v43, %v1863_v5  ;;  %v1889_v0 = vadd.f32 %v1888_v59, %v1887_v19 }
 0x504   : > { %v1638_v33 = vadd.f32 %v1865_v25, %v3518_v13  ;;  %v1678_v36 = vadd.f32 %v1889_v0, %v3518_v13 }
 0x506   : > { %1688 = vst [vmem:[%s3604_s7 + $0x38] sm:$0xff] %v1638_v33  ;;  %1696 = vst [vmem:[%s3604_s7 + $0x78] sm:$0xff] %v1678_v36 }
 0x507 PF: > { %p20_p0 = scmp.ge.s32.totalorder %s2788_s18, 10   ;;  %s3656_s24 = smov %s2582_s25 }
 0x508   : > { %s3657_s25 = smov %s2586_s26  ;;  %s3658_s26 = smov %s2798_s22 }
 0x509   : > { %s3659_s27 = smov %s2788_s18  ;;  %22 = sbr.rel (!%p20_p0) target bundleno = 6 (0x6), region = 113 }
 0x510   :  { %1708 = vsyncpa [#allocation5], 1 }
 0x511   :  { %1710 = vsyncpa [#allocation5 + $0x1], 1 }
 0x512   :  { %1711 = vsyncpa [#allocation7], 1 }
 0x513   :  { %1712 = vsyncpa [#allocation10], 1 }
 0x514   :  { %1714 = vsyncpa [#allocation10 + $0x1], 1 }
 0x515   :  { %1715 = vsyncpa [#allocation13], 1 }

</bundles_post_ra>
